<compile_context>
chip_gen: v7x
topology: tpu7x:2x2x1
jax: 0.10.0
libtpu: 0.0.40
codegen_flags: <defaults>
</compile_context>

<pallas_src>
import jax
import jax.numpy as jnp
from jax.experimental import pallas as pl

D_MODEL = 32          # model_dimension
N_HEADS = 4
D_HEAD = D_MODEL // N_HEADS
DROPOUT_P = 0.1       # dropout_probability (training mode, inverted scaling)
LN_EPS = 1e-5         # torch.nn.LayerNorm default eps


def sublayer_kernel(srb1_ref, srb2_ref,             # (B, S, D) activations
                    gamma_ref, beta_ref,            # (1, D) shared LayerNorm affine
                    wq_ref, wkv_ref, wo_ref,        # (D,D), (D,2D), (D,D) mha weights
                    rand_ref,                       # (B, S, D) uniform[0,1) for dropout
                    out_ref):                       # (B, S, D)
    B, S, D = srb1_ref.shape
    H, Dh = N_HEADS, D // N_HEADS

    x1 = srb1_ref[...].astype(jnp.float32)          # (B, S, D)
    x2 = srb2_ref[...].astype(jnp.float32)
    gamma = gamma_ref[...].astype(jnp.float32)      # (1, D)
    beta = beta_ref[...].astype(jnp.float32)        # (1, D)

    def layer_norm(x):
        mu = jnp.mean(x, axis=-1, keepdims=True)
        xc = x - mu
        var = jnp.mean(xc * xc, axis=-1, keepdims=True)
        inv = jax.lax.rsqrt(var + LN_EPS)
        return xc * (inv * gamma) + beta            # folded affine

    # Same nn.LayerNorm (same gamma/beta) applied to both inputs, per the spec.
    n1 = layer_norm(x1).reshape(B * S, D)
    n2 = layer_norm(x2).reshape(B * S, D)

    # Q projection + fused K|V projection: two MXU passes over all B*S rows.
    q = jnp.dot(n1, wq_ref[...], preferred_element_type=jnp.float32)    # (BS, D)
    kv = jnp.dot(n2, wkv_ref[...], preferred_element_type=jnp.float32)  # (BS, 2D)
    k, v = kv[:, :D], kv[:, D:]

    q = q.reshape(B, S, H, Dh)
    k = k.reshape(B, S, H, Dh)
    v = v.reshape(B, S, H, Dh)

    scale = 1.0 / (Dh ** 0.5)
    inv_keep = 1.0 / (1.0 - DROPOUT_P)

    # Static unroll over the tiny batch axis; all heads batched in one einsum.
    for b in range(B):
        s = jnp.einsum('qhd,khd->hqk', q[b], k[b],
                       preferred_element_type=jnp.float32) * scale        # (H, S, S)
        s = s - jnp.max(s, axis=-1, keepdims=True)
        p = jnp.exp(s)
        p = p * (1.0 / jnp.sum(p, axis=-1, keepdims=True))
        ctx = jnp.einsum('hqk,khd->qhd', p, v[b],
                         preferred_element_type=jnp.float32).reshape(S, D)
        mha_b = jnp.dot(ctx, wo_ref[...], preferred_element_type=jnp.float32)

        # Dropout (training mode, inverted scaling) + residual add.
        keep = rand_ref[b] >= DROPOUT_P
        dropped = jnp.where(keep, mha_b * inv_keep, 0.0)
        out_ref[b] = (x1[b] + dropped).astype(out_ref.dtype)


def sublayer_logic(srb1, srb2, gamma, beta, wq, wk, wv, wo, dropout_key):
    B, S, D = srb1.shape
    # Fuse K and V projection weights into one (D, 2D) matmul operand.
    wkv = jnp.concatenate([wk, wv], axis=1)
    # Dropout randoms generated outside the kernel (portable across TPU + interpret).
    rand = jax.random.uniform(dropout_key, (B, S, D), dtype=jnp.float32)

    def full(shape):
        return pl.BlockSpec(shape, lambda: (0,) * len(shape))

    # Whole problem resident in VMEM, single invocation (grid=()): no per-step
    # grid overhead, no double-buffering of the 9 tiny operands.
    return pl.pallas_call(
        sublayer_kernel,
        out_shape=jax.ShapeDtypeStruct((B, S, D), srb1.dtype),
        in_specs=[full((B, S, D)), full((B, S, D)),
                  full((1, D)), full((1, D)),
                  full((D, D)), full((D, 2 * D)), full((D, D)),
                  full((B, S, D))],
        out_specs=full((B, S, D)),
    )(srb1, srb2, gamma, beta, wq, wkv, wo, rand)


def _reference(srb1, srb2, gamma, beta, wq, wk, wv, wo, rand):
    """Pure-JAX reference of the same forward pass (same dropout mask)."""
    B, S, D = srb1.shape
    H, Dh = N_HEADS, D // N_HEADS

    def ln(x):
        mu = x.mean(-1, keepdims=True)
        var = ((x - mu) ** 2).mean(-1, keepdims=True)
        return (x - mu) / jnp.sqrt(var + LN_EPS) * gamma + beta

    n1, n2 = ln(srb1), ln(srb2)
    q = (n1 @ wq).reshape(B, S, H, Dh)
    k = (n2 @ wk).reshape(B, S, H, Dh)
    v = (n2 @ wv).reshape(B, S, H, Dh)
    s = jnp.einsum('bqhd,bkhd->bhqk', q, k) / (Dh ** 0.5)
    p = jax.nn.softmax(s, axis=-1)
    ctx = jnp.einsum('bhqk,bkhd->bqhd', p, v).reshape(B, S, D)
    mha = ctx @ wo
    return srb1 + jnp.where(rand >= DROPOUT_P, mha / (1.0 - DROPOUT_P), 0.0)


if __name__ == "__main__":
    B, S, D = 2, 8, D_MODEL

    key = jax.random.PRNGKey(0)
    k1, k2, kq, kk, kv, ko, kd = jax.random.split(key, 7)

    srb1 = jax.random.normal(k1, (B, S, D), dtype=jnp.float32)
    srb2 = jax.random.normal(k2, (B, S, D), dtype=jnp.float32)

    # LayerNorm params (PyTorch default init: weight=1, bias=0).
    gamma = jnp.ones((1, D), dtype=jnp.float32)
    beta = jnp.zeros((1, D), dtype=jnp.float32)

    # Deterministic mha projection weights.
    init = 1.0 / (D ** 0.5)
    wq = jax.random.normal(kq, (D, D), dtype=jnp.float32) * init
    wk = jax.random.normal(kk, (D, D), dtype=jnp.float32) * init
    wv = jax.random.normal(kv, (D, D), dtype=jnp.float32) * init
    wo = jax.random.normal(ko, (D, D), dtype=jnp.float32) * init

    out = sublayer_logic(srb1, srb2, gamma, beta, wq, wk, wv, wo, kd)
    jax.block_until_ready(out)
    assert out.shape == (B, S, D) and out.dtype == jnp.float32

    # Numerical cross-check against a pure-JAX reference with the same mask.
    rand = jax.random.uniform(kd, (B, S, D), dtype=jnp.float32)
    ref = _reference(srb1, srb2, gamma, beta, wq, wk, wv, wo, rand)
    assert jnp.allclose(out, ref, rtol=1e-2, atol=1e-2), float(jnp.abs(out - ref).max())

    print("KERNEL_OK")
</pallas_src>

<mosaic_0001>
module attributes {stable_mosaic.version = 11 : i64} {
  func.func @sublayer_kernel(%arg0: memref<2x8x32xf32, #tpu.memory_space<vmem>>, %arg1: memref<2x8x32xf32, #tpu.memory_space<vmem>>, %arg2: memref<1x32xf32, #tpu.memory_space<vmem>>, %arg3: memref<1x32xf32, #tpu.memory_space<vmem>>, %arg4: memref<32x32xf32, #tpu.memory_space<vmem>>, %arg5: memref<32x64xf32, #tpu.memory_space<vmem>>, %arg6: memref<32x32xf32, #tpu.memory_space<vmem>>, %arg7: memref<2x8x32xf32, #tpu.memory_space<vmem>>, %arg8: memref<2x8x32xf32, #tpu.memory_space<vmem>>) attributes {dimension_semantics = [], scalar_prefetch = 0 : i64, scratch_operands = 0 : i64, tpu.core_type = #tpu.core_type<tc>} {
    %c0 = arith.constant 0 : index
    %c0_0 = arith.constant 0 : index
    %c0_1 = arith.constant 0 : index
    %0 = vector.load %arg0[%c0, %c0_0, %c0_1] : memref<2x8x32xf32, #tpu.memory_space<vmem>>, vector<2x8x32xf32>
    %c0_2 = arith.constant 0 : index
    %c0_3 = arith.constant 0 : index
    %c0_4 = arith.constant 0 : index
    %1 = vector.load %arg1[%c0_2, %c0_3, %c0_4] : memref<2x8x32xf32, #tpu.memory_space<vmem>>, vector<2x8x32xf32>
    %c0_5 = arith.constant 0 : index
    %c0_6 = arith.constant 0 : index
    %2 = vector.load %arg2[%c0_5, %c0_6] : memref<1x32xf32, #tpu.memory_space<vmem>>, vector<1x32xf32>
    %c0_7 = arith.constant 0 : index
    %c0_8 = arith.constant 0 : index
    %3 = vector.load %arg3[%c0_7, %c0_8] : memref<1x32xf32, #tpu.memory_space<vmem>>, vector<1x32xf32>
    %cst = arith.constant dense<0.000000e+00> : vector<2x8xf32>
    %4 = vector.multi_reduction <add>, %0, %cst [2] : vector<2x8x32xf32> to vector<2x8xf32>
    %5 = vector.shape_cast %4 : vector<2x8xf32> to vector<2x8x1xf32>
    %cst_9 = arith.constant 3.200000e+01 : f32
    %6 = vector.broadcast %cst_9 : f32 to vector<2x8x1xf32>
    %7 = arith.divf %5, %6 : vector<2x8x1xf32>
    %8 = vector.broadcast %7 : vector<2x8x1xf32> to vector<2x8x32xf32>
    %9 = arith.subf %0, %8 : vector<2x8x32xf32>
    %10 = arith.mulf %9, %9 : vector<2x8x32xf32>
    %cst_10 = arith.constant dense<0.000000e+00> : vector<2x8xf32>
    %11 = vector.multi_reduction <add>, %10, %cst_10 [2] : vector<2x8x32xf32> to vector<2x8xf32>
    %12 = vector.shape_cast %11 : vector<2x8xf32> to vector<2x8x1xf32>
    %cst_11 = arith.constant 3.200000e+01 : f32
    %13 = vector.broadcast %cst_11 : f32 to vector<2x8x1xf32>
    %14 = arith.divf %12, %13 : vector<2x8x1xf32>
    %cst_12 = arith.constant 9.99999974E-6 : f32
    %15 = vector.broadcast %cst_12 : f32 to vector<2x8x1xf32>
    %16 = arith.addf %14, %15 : vector<2x8x1xf32>
    %17 = math.rsqrt %16 : vector<2x8x1xf32>
    %18 = vector.shape_cast %2 : vector<1x32xf32> to vector<1x1x32xf32>
    %19 = vector.broadcast %17 : vector<2x8x1xf32> to vector<2x8x32xf32>
    %20 = vector.broadcast %18 : vector<1x1x32xf32> to vector<2x8x32xf32>
    %21 = arith.mulf %19, %20 : vector<2x8x32xf32>
    %22 = arith.mulf %9, %21 : vector<2x8x32xf32>
    %23 = vector.shape_cast %3 : vector<1x32xf32> to vector<1x1x32xf32>
    %24 = vector.broadcast %23 : vector<1x1x32xf32> to vector<2x8x32xf32>
    %25 = arith.addf %22, %24 : vector<2x8x32xf32>
    %26 = vector.shape_cast %25 : vector<2x8x32xf32> to vector<16x32xf32>
    %cst_13 = arith.constant dense<0.000000e+00> : vector<2x8xf32>
    %27 = vector.multi_reduction <add>, %1, %cst_13 [2] : vector<2x8x32xf32> to vector<2x8xf32>
    %28 = vector.shape_cast %27 : vector<2x8xf32> to vector<2x8x1xf32>
    %cst_14 = arith.constant 3.200000e+01 : f32
    %29 = vector.broadcast %cst_14 : f32 to vector<2x8x1xf32>
    %30 = arith.divf %28, %29 : vector<2x8x1xf32>
    %31 = vector.broadcast %30 : vector<2x8x1xf32> to vector<2x8x32xf32>
    %32 = arith.subf %1, %31 : vector<2x8x32xf32>
    %33 = arith.mulf %32, %32 : vector<2x8x32xf32>
    %cst_15 = arith.constant dense<0.000000e+00> : vector<2x8xf32>
    %34 = vector.multi_reduction <add>, %33, %cst_15 [2] : vector<2x8x32xf32> to vector<2x8xf32>
    %35 = vector.shape_cast %34 : vector<2x8xf32> to vector<2x8x1xf32>
    %cst_16 = arith.constant 3.200000e+01 : f32
    %36 = vector.broadcast %cst_16 : f32 to vector<2x8x1xf32>
    %37 = arith.divf %35, %36 : vector<2x8x1xf32>
    %cst_17 = arith.constant 9.99999974E-6 : f32
    %38 = vector.broadcast %cst_17 : f32 to vector<2x8x1xf32>
    %39 = arith.addf %37, %38 : vector<2x8x1xf32>
    %40 = math.rsqrt %39 : vector<2x8x1xf32>
    %41 = vector.shape_cast %2 : vector<1x32xf32> to vector<1x1x32xf32>
    %42 = vector.broadcast %40 : vector<2x8x1xf32> to vector<2x8x32xf32>
    %43 = vector.broadcast %41 : vector<1x1x32xf32> to vector<2x8x32xf32>
    %44 = arith.mulf %42, %43 : vector<2x8x32xf32>
    %45 = arith.mulf %32, %44 : vector<2x8x32xf32>
    %46 = vector.shape_cast %3 : vector<1x32xf32> to vector<1x1x32xf32>
    %47 = vector.broadcast %46 : vector<1x1x32xf32> to vector<2x8x32xf32>
    %48 = arith.addf %45, %47 : vector<2x8x32xf32>
    %49 = vector.shape_cast %48 : vector<2x8x32xf32> to vector<16x32xf32>
    %c0_18 = arith.constant 0 : index
    %c0_19 = arith.constant 0 : index
    %50 = vector.load %arg4[%c0_18, %c0_19] : memref<32x32xf32, #tpu.memory_space<vmem>>, vector<32x32xf32>
    %cst_20 = arith.constant dense<0.000000e+00> : vector<16x32xf32>
    %51 = tpu.matmul %26, %50, %cst_20 {dimension_numbers = #tpu.dot_dimension_numbers<[1], [0], [0], [1], [0, 0, 1, 1], [], []>} : vector<16x32xf32>, vector<32x32xf32>, vector<16x32xf32> -> vector<16x32xf32>
    %c0_21 = arith.constant 0 : index
    %c0_22 = arith.constant 0 : index
    %52 = vector.load %arg5[%c0_21, %c0_22] : memref<32x64xf32, #tpu.memory_space<vmem>>, vector<32x64xf32>
    %cst_23 = arith.constant dense<0.000000e+00> : vector<16x64xf32>
    %53 = tpu.matmul %49, %52, %cst_23 {dimension_numbers = #tpu.dot_dimension_numbers<[1], [0], [0], [1], [0, 0, 1, 1], [], []>} : vector<16x32xf32>, vector<32x64xf32>, vector<16x64xf32> -> vector<16x64xf32>
    %54 = vector.extract_strided_slice %53 {offsets = [0, 0], sizes = [16, 32], strides = [1, 1]} : vector<16x64xf32> to vector<16x32xf32>
    %55 = vector.extract_strided_slice %53 {offsets = [0, 32], sizes = [16, 32], strides = [1, 1]} : vector<16x64xf32> to vector<16x32xf32>
    %56 = vector.shape_cast %51 : vector<16x32xf32> to vector<2x8x4x8xf32>
    %57 = vector.shape_cast %54 : vector<16x32xf32> to vector<2x8x4x8xf32>
    %58 = vector.shape_cast %55 : vector<16x32xf32> to vector<2x8x4x8xf32>
    %59 = vector.extract_strided_slice %56 {offsets = [0, 0, 0, 0], sizes = [1, 8, 4, 8], strides = [1, 1, 1, 1]} : vector<2x8x4x8xf32> to vector<1x8x4x8xf32>
    %60 = vector.shape_cast %59 : vector<1x8x4x8xf32> to vector<8x4x8xf32>
    %61 = vector.extract_strided_slice %57 {offsets = [0, 0, 0, 0], sizes = [1, 8, 4, 8], strides = [1, 1, 1, 1]} : vector<2x8x4x8xf32> to vector<1x8x4x8xf32>
    %62 = vector.shape_cast %61 : vector<1x8x4x8xf32> to vector<8x4x8xf32>
    "tpu.trace_start"() <{level = 10 : i32, message = "qhd,khd->hqk"}> : () -> ()
    %cst_24 = arith.constant dense<0.000000e+00> : vector<4x8x8xf32>
    %63 = tpu.matmul %60, %62, %cst_24 {dimension_numbers = #tpu.dot_dimension_numbers<[2], [2], [0], [0], [0, 1, 0, 0, 1, 0], [1], [1]>} : vector<8x4x8xf32>, vector<8x4x8xf32>, vector<4x8x8xf32> -> vector<4x8x8xf32>
    "tpu.trace_stop"() : () -> ()
    %cst_25 = arith.constant 0.353553385 : f32
    %64 = vector.broadcast %cst_25 : f32 to vector<4x8x8xf32>
    %65 = arith.mulf %63, %64 : vector<4x8x8xf32>
    %cst_26 = arith.constant dense<0xFF800000> : vector<4x8xf32>
    %66 = vector.multi_reduction <maximumf>, %65, %cst_26 [2] : vector<4x8x8xf32> to vector<4x8xf32>
    %67 = vector.shape_cast %66 : vector<4x8xf32> to vector<4x8x1xf32>
    %68 = vector.broadcast %67 : vector<4x8x1xf32> to vector<4x8x8xf32>
    %69 = arith.subf %65, %68 : vector<4x8x8xf32>
    %70 = math.exp %69 : vector<4x8x8xf32>
    %cst_27 = arith.constant dense<0.000000e+00> : vector<4x8xf32>
    %71 = vector.multi_reduction <add>, %70, %cst_27 [2] : vector<4x8x8xf32> to vector<4x8xf32>
    %72 = vector.shape_cast %71 : vector<4x8xf32> to vector<4x8x1xf32>
    %cst_28 = arith.constant 1.000000e+00 : f32
    %73 = vector.broadcast %cst_28 : f32 to vector<4x8x1xf32>
    %74 = arith.divf %73, %72 : vector<4x8x1xf32>
    %75 = vector.broadcast %74 : vector<4x8x1xf32> to vector<4x8x8xf32>
    %76 = arith.mulf %70, %75 : vector<4x8x8xf32>
    %77 = vector.extract_strided_slice %58 {offsets = [0, 0, 0, 0], sizes = [1, 8, 4, 8], strides = [1, 1, 1, 1]} : vector<2x8x4x8xf32> to vector<1x8x4x8xf32>
    %78 = vector.shape_cast %77 : vector<1x8x4x8xf32> to vector<8x4x8xf32>
    "tpu.trace_start"() <{level = 10 : i32, message = "hqk,khd->qhd"}> : () -> ()
    %cst_29 = arith.constant dense<0.000000e+00> : vector<4x8x8xf32>
    %79 = tpu.matmul %78, %76, %cst_29 {dimension_numbers = #tpu.dot_dimension_numbers<[0], [2], [2], [1], [0, 1, 0, 2, 1, 1], [1], [0]>} : vector<8x4x8xf32>, vector<4x8x8xf32>, vector<4x8x8xf32> -> vector<4x8x8xf32>
    %80 = tpu.transpose %79, [2, 0, 1] : vector<4x8x8xf32> -> vector<8x4x8xf32>
    "tpu.trace_stop"() : () -> ()
    %81 = vector.shape_cast %80 : vector<8x4x8xf32> to vector<8x32xf32>
    %c0_30 = arith.constant 0 : index
    %c0_31 = arith.constant 0 : index
    %82 = vector.load %arg6[%c0_30, %c0_31] : memref<32x32xf32, #tpu.memory_space<vmem>>, vector<32x32xf32>
    %cst_32 = arith.constant dense<0.000000e+00> : vector<8x32xf32>
    %83 = tpu.matmul %81, %82, %cst_32 {dimension_numbers = #tpu.dot_dimension_numbers<[1], [0], [0], [1], [0, 0, 1, 1], [], []>} : vector<8x32xf32>, vector<32x32xf32>, vector<8x32xf32> -> vector<8x32xf32>
    %c0_33 = arith.constant 0 : index
    %c0_34 = arith.constant 0 : index
    %c0_35 = arith.constant 0 : index
    %84 = vector.load %arg7[%c0_33, %c0_34, %c0_35] : memref<2x8x32xf32, #tpu.memory_space<vmem>>, vector<1x8x32xf32>
    %85 = vector.shape_cast %84 : vector<1x8x32xf32> to vector<8x32xf32>
    %cst_36 = arith.constant 1.000000e-01 : f32
    %86 = vector.broadcast %cst_36 : f32 to vector<8x32xf32>
    %87 = arith.cmpf oge, %85, %86 : vector<8x32xf32>
    %cst_37 = arith.constant 1.11111116 : f32
    %88 = vector.broadcast %cst_37 : f32 to vector<8x32xf32>
    %89 = arith.mulf %83, %88 : vector<8x32xf32>
    %cst_38 = arith.constant 0.000000e+00 : f32
    %90 = vector.broadcast %cst_38 : f32 to vector<8x32xf32>
    %91 = arith.select %87, %89, %90 : vector<8x32xi1>, vector<8x32xf32>
    %92 = vector.extract_strided_slice %0 {offsets = [0, 0, 0], sizes = [1, 8, 32], strides = [1, 1, 1]} : vector<2x8x32xf32> to vector<1x8x32xf32>
    %93 = vector.shape_cast %92 : vector<1x8x32xf32> to vector<8x32xf32>
    %94 = arith.addf %93, %91 : vector<8x32xf32>
    %c0_39 = arith.constant 0 : index
    %c0_40 = arith.constant 0 : index
    %c0_41 = arith.constant 0 : index
    %95 = vector.load %arg8[%c0_39, %c0_40, %c0_41] : memref<2x8x32xf32, #tpu.memory_space<vmem>>, vector<1x8x32xf32>
    %96 = vector.shape_cast %95 : vector<1x8x32xf32> to vector<8x32xf32>
    %97 = vector.shape_cast %94 : vector<8x32xf32> to vector<1x8x32xf32>
    tpu.vector_store %arg8[%c0_39, %c0_40, %c0_41], %97 {strides = array<i32>} : memref<2x8x32xf32, #tpu.memory_space<vmem>>, vector<1x8x32xf32>,
    %98 = vector.extract_strided_slice %56 {offsets = [1, 0, 0, 0], sizes = [1, 8, 4, 8], strides = [1, 1, 1, 1]} : vector<2x8x4x8xf32> to vector<1x8x4x8xf32>
    %99 = vector.shape_cast %98 : vector<1x8x4x8xf32> to vector<8x4x8xf32>
    %100 = vector.extract_strided_slice %57 {offsets = [1, 0, 0, 0], sizes = [1, 8, 4, 8], strides = [1, 1, 1, 1]} : vector<2x8x4x8xf32> to vector<1x8x4x8xf32>
    %101 = vector.shape_cast %100 : vector<1x8x4x8xf32> to vector<8x4x8xf32>
    "tpu.trace_start"() <{level = 10 : i32, message = "qhd,khd->hqk"}> : () -> ()
    %cst_42 = arith.constant dense<0.000000e+00> : vector<4x8x8xf32>
    %102 = tpu.matmul %99, %101, %cst_42 {dimension_numbers = #tpu.dot_dimension_numbers<[2], [2], [0], [0], [0, 1, 0, 0, 1, 0], [1], [1]>} : vector<8x4x8xf32>, vector<8x4x8xf32>, vector<4x8x8xf32> -> vector<4x8x8xf32>
    "tpu.trace_stop"() : () -> ()
    %cst_43 = arith.constant 0.353553385 : f32
    %103 = vector.broadcast %cst_43 : f32 to vector<4x8x8xf32>
    %104 = arith.mulf %102, %103 : vector<4x8x8xf32>
    %cst_44 = arith.constant dense<0xFF800000> : vector<4x8xf32>
    %105 = vector.multi_reduction <maximumf>, %104, %cst_44 [2] : vector<4x8x8xf32> to vector<4x8xf32>
    %106 = vector.shape_cast %105 : vector<4x8xf32> to vector<4x8x1xf32>
    %107 = vector.broadcast %106 : vector<4x8x1xf32> to vector<4x8x8xf32>
    %108 = arith.subf %104, %107 : vector<4x8x8xf32>
    %109 = math.exp %108 : vector<4x8x8xf32>
    %cst_45 = arith.constant dense<0.000000e+00> : vector<4x8xf32>
    %110 = vector.multi_reduction <add>, %109, %cst_45 [2] : vector<4x8x8xf32> to vector<4x8xf32>
    %111 = vector.shape_cast %110 : vector<4x8xf32> to vector<4x8x1xf32>
    %cst_46 = arith.constant 1.000000e+00 : f32
    %112 = vector.broadcast %cst_46 : f32 to vector<4x8x1xf32>
    %113 = arith.divf %112, %111 : vector<4x8x1xf32>
    %114 = vector.broadcast %113 : vector<4x8x1xf32> to vector<4x8x8xf32>
    %115 = arith.mulf %109, %114 : vector<4x8x8xf32>
    %116 = vector.extract_strided_slice %58 {offsets = [1, 0, 0, 0], sizes = [1, 8, 4, 8], strides = [1, 1, 1, 1]} : vector<2x8x4x8xf32> to vector<1x8x4x8xf32>
    %117 = vector.shape_cast %116 : vector<1x8x4x8xf32> to vector<8x4x8xf32>
    "tpu.trace_start"() <{level = 10 : i32, message = "hqk,khd->qhd"}> : () -> ()
    %cst_47 = arith.constant dense<0.000000e+00> : vector<4x8x8xf32>
    %118 = tpu.matmul %117, %115, %cst_47 {dimension_numbers = #tpu.dot_dimension_numbers<[0], [2], [2], [1], [0, 1, 0, 2, 1, 1], [1], [0]>} : vector<8x4x8xf32>, vector<4x8x8xf32>, vector<4x8x8xf32> -> vector<4x8x8xf32>
    %119 = tpu.transpose %118, [2, 0, 1] : vector<4x8x8xf32> -> vector<8x4x8xf32>
    "tpu.trace_stop"() : () -> ()
    %120 = vector.shape_cast %119 : vector<8x4x8xf32> to vector<8x32xf32>
    %c0_48 = arith.constant 0 : index
    %c0_49 = arith.constant 0 : index
    %121 = vector.load %arg6[%c0_48, %c0_49] : memref<32x32xf32, #tpu.memory_space<vmem>>, vector<32x32xf32>
    %cst_50 = arith.constant dense<0.000000e+00> : vector<8x32xf32>
    %122 = tpu.matmul %120, %121, %cst_50 {dimension_numbers = #tpu.dot_dimension_numbers<[1], [0], [0], [1], [0, 0, 1, 1], [], []>} : vector<8x32xf32>, vector<32x32xf32>, vector<8x32xf32> -> vector<8x32xf32>
    %c1 = arith.constant 1 : index
    %c0_51 = arith.constant 0 : index
    %c0_52 = arith.constant 0 : index
    %123 = vector.load %arg7[%c1, %c0_51, %c0_52] : memref<2x8x32xf32, #tpu.memory_space<vmem>>, vector<1x8x32xf32>
    %124 = vector.shape_cast %123 : vector<1x8x32xf32> to vector<8x32xf32>
    %cst_53 = arith.constant 1.000000e-01 : f32
    %125 = vector.broadcast %cst_53 : f32 to vector<8x32xf32>
    %126 = arith.cmpf oge, %124, %125 : vector<8x32xf32>
    %cst_54 = arith.constant 1.11111116 : f32
    %127 = vector.broadcast %cst_54 : f32 to vector<8x32xf32>
    %128 = arith.mulf %122, %127 : vector<8x32xf32>
    %cst_55 = arith.constant 0.000000e+00 : f32
    %129 = vector.broadcast %cst_55 : f32 to vector<8x32xf32>
    %130 = arith.select %126, %128, %129 : vector<8x32xi1>, vector<8x32xf32>
    %131 = vector.extract_strided_slice %0 {offsets = [1, 0, 0], sizes = [1, 8, 32], strides = [1, 1, 1]} : vector<2x8x32xf32> to vector<1x8x32xf32>
    %132 = vector.shape_cast %131 : vector<1x8x32xf32> to vector<8x32xf32>
    %133 = arith.addf %132, %130 : vector<8x32xf32>
    %c1_56 = arith.constant 1 : index
    %c0_57 = arith.constant 0 : index
    %c0_58 = arith.constant 0 : index
    %134 = vector.load %arg8[%c1_56, %c0_57, %c0_58] : memref<2x8x32xf32, #tpu.memory_space<vmem>>, vector<1x8x32xf32>
    %135 = vector.shape_cast %134 : vector<1x8x32xf32> to vector<8x32xf32>
    %136 = vector.shape_cast %133 : vector<8x32xf32> to vector<1x8x32xf32>
    tpu.vector_store %arg8[%c1_56, %c0_57, %c0_58], %136 {strides = array<i32>} : memref<2x8x32xf32, #tpu.memory_space<vmem>>, vector<1x8x32xf32>,
    return
  }
}

</mosaic_0001>

<bundles_post_ra>
// kernel: tpu_custom_call.1
= control target key start
LH: loop header
LB: loop body
LE: loop exit
PB: predicated region body
PF: predicated region fallthrough
CT: control target
= control target key end

     0   :  { %13 = vsyncpa [#allocation3], 0  ;;  %s7046_s0 = inlined_call_operand.hbm [shape: f32[2,8,32], index: 0, kind: input, shape index: {}]   ;;  %s7047_s1 = inlined_call_operand.hbm [shape: f32[2,8,32], index: 1, kind: input, shape index: {}]   ;;  %s7048_s2 = inlined_call_operand.vmem [shape: f32[1,32], index: 2, kind: input, shape index: {}]   ;;  %s7049_s3 = inlined_call_operand.vmem [shape: f32[1,32], index: 3, kind: input, shape index: {}]   ;;  %s7050_s4 = inlined_call_operand.hbm [shape: f32[32,32], index: 4, kind: input, shape index: {}]   ;;  %s7051_s5 = inlined_call_operand.hbm [shape: f32[32,64], index: 5, kind: input, shape index: {}]   ;;  %s7052_s6 = inlined_call_operand.hbm [shape: f32[32,32], index: 6, kind: input, shape index: {}]   ;;  %s7053_s7 = inlined_call_operand.vmem [shape: f32[2,8,32], index: 7, kind: input, shape index: {}]   ;;  %s7054_s8 = inlined_call_operand.hbm [shape: f32[2,8,32], index: 8, kind: output, shape index: {}]  }
   0x1   :  { %14 = vsyncpa [#allocation6], 0 }
   0x2   :  { %15 = vsyncpa [#allocation9], 0 }
   0x3   :  { %16 = vsyncpa [#allocation4], 0  ;;  %s6312_s27 = smov [#allocation5]   ;;  %s6313_s29 = smov [#allocation8]  }
   0x4   :  { %s34_s28 = sshll.u32 %s6312_s27, 4  ;;  %s62_s30 = sshll.u32 %s6313_s29, 4  ;;  %s35_s28 = int_to_ptr.vmem [resolvable:$true] %s34_s28  ;;  %s6376_s30 = int_to_ptr.vmem [resolvable:$true] %s62_s30 }
   0x5   :  { %s6172_s11 = scalar_lea.hbm %s7047_s1, 256 }
   0x6   :  { %p6173_p0 = scmp.ne.s32.totalorder %s7047_s1, %s6172_s11  ;;  %p6176_p1 = scmp.lt.u32.totalorder %s6172_s11, %s7047_s1 }
   0x8   :  { %p6178_p2 = pnand %p6176_p1, %p6173_p0 }
   0xa   :  { %6181 = shalt.err (!%p6178_p2)
}
   0xb   :  { %s6182_s16 = scalar_lea.vmem %s35_s28, 256  ;;  %p6187_p4 = scmp.lt.s32.totalorder %s35_s28, %s35_s28 }
   0xc   :  { %p6183_p3 = scmp.ne.s32.totalorder %s35_s28, %s6182_s16  ;;  %p6188_p5 = scmp.lt.s32.totalorder %s6182_s16, %s6182_s16 }
   0xe   :  { %p6189_p6 = por %p6188_p5, %p6187_p4 }
  0x10   :  { %p6190_p7 = pnand %p6189_p6, %p6183_p3 }
  0x12   :  { %6193 = shalt.err (!%p6190_p7)
}
  0x13   :  { %s6314_s17 = smov 128   ;;  %s6315_s18 = smov 8  }
  0x14   :  { %40 = dma.hbm_to_vmem [thread:$0]  %s7047_s1, 256, %s35_s28, [#allocation6], %s6314_s17, %s6314_s17, %s6315_s18  }
  0x15   :  { %s6194_s23 = scalar_lea.hbm %s7051_s5, 512 }
  0x16   :  { %p6195_p8 = scmp.ne.s32.totalorder %s7051_s5, %s6194_s23  ;;  %p6198_p9 = scmp.lt.u32.totalorder %s6194_s23, %s7051_s5 }
  0x18   :  { %p6200_p10 = pnand %p6198_p9, %p6195_p8 }
  0x1a   :  { %6203 = shalt.err (!%p6200_p10)
}
  0x1b   :  { %s6204_s29 = scalar_lea.vmem %s6376_s30, 512  ;;  %p6209_p12 = scmp.lt.s32.totalorder %s6376_s30, %s6376_s30 }
  0x1c   :  { %p6205_p11 = scmp.ne.s32.totalorder %s6376_s30, %s6204_s29  ;;  %p6210_p13 = scmp.lt.s32.totalorder %s6204_s29, %s6204_s29 }
  0x1e   :  { %p6211_p0 = por %p6210_p13, %p6209_p12 }
  0x20   :  { %p6212_p1 = pnand %p6211_p0, %p6205_p11 }
  0x22   :  { %6215 = shalt.err (!%p6212_p1)
}
  0x23   :  { %68 = dma.hbm_to_vmem [thread:$0]  %s7051_s5, 512, %s6376_s30, [#allocation9], %s6314_s17, %s6314_s17, %s6315_s18  }
  0x24   :  { %s6316_s9 = smov [#allocation2]   ;;  %s6317_s11 = smov [#allocation7]  }
  0x25   :  { %s22_s10 = sshll.u32 %s6316_s9, 4  ;;  %s50_s12 = sshll.u32 %s6317_s11, 4  ;;  %s23_s10 = int_to_ptr.vmem [resolvable:$true] %s22_s10  ;;  %s6413_s12 = int_to_ptr.vmem [resolvable:$true] %s50_s12 }
  0x26   :  { %s6216_s15 = scalar_lea.hbm %s7046_s0, 256 }
  0x27   :  { %p6217_p2 = scmp.ne.s32.totalorder %s7046_s0, %s6216_s15  ;;  %p6220_p3 = scmp.lt.u32.totalorder %s6216_s15, %s7046_s0 }
  0x29   :  { %p6222_p4 = pnand %p6220_p3, %p6217_p2 }
  0x2b   :  { %6225 = shalt.err (!%p6222_p4)
}
  0x2c   :  { %s6226_s5 = scalar_lea.vmem %s23_s10, 256  ;;  %p6231_p6 = scmp.lt.s32.totalorder %s23_s10, %s23_s10 }
  0x2d   :  { %p6227_p5 = scmp.ne.s32.totalorder %s23_s10, %s6226_s5  ;;  %p6232_p7 = scmp.lt.s32.totalorder %s6226_s5, %s6226_s5 }
  0x2f   :  { %p6233_p8 = por %p6232_p7, %p6231_p6 }
  0x31   :  { %p6234_p9 = pnand %p6233_p8, %p6227_p5 }
  0x33   :  { %6237 = shalt.err (!%p6234_p9)
}
  0x34   :  { %28 = dma.hbm_to_vmem [thread:$0]  %s7046_s0, 256, %s23_s10, [#allocation3], %s6314_s17, %s6314_s17, %s6315_s18  }
  0x35   :  { %s6238_s25 = scalar_lea.hbm %s7050_s4, 512 }
  0x36   :  { %p6239_p10 = scmp.ne.s32.totalorder %s7050_s4, %s6238_s25  ;;  %p6242_p11 = scmp.lt.u32.totalorder %s6238_s25, %s7050_s4 }
  0x38   :  { %p6244_p12 = pnand %p6242_p11, %p6239_p10 }
  0x3a   :  { %6247 = shalt.err (!%p6244_p12)
}
  0x3b   :  { %s6248_s28 = scalar_lea.vmem %s6413_s12, 512  ;;  %p6253_p0 = scmp.lt.s32.totalorder %s6413_s12, %s6413_s12 }
  0x3c   :  { %p6249_p13 = scmp.ne.s32.totalorder %s6413_s12, %s6248_s28  ;;  %p6254_p1 = scmp.lt.s32.totalorder %s6248_s28, %s6248_s28 }
  0x3e   :  { %p6255_p2 = por %p6254_p1, %p6253_p0 }
  0x40   :  { %p6256_p3 = pnand %p6255_p2, %p6249_p13 }
  0x42   :  { %6259 = shalt.err (!%p6256_p3)
}
  0x43   :  { %56 = dma.hbm_to_vmem [thread:$0]  %s7050_s4, 512, %s6413_s12, [#allocation6], %s6314_s17, %s6314_s17, %s6315_s18  }
  0x44   :  { %s6318_s10 = smov [#allocation10]   ;;  %s6260_s15 = scalar_lea.hbm %s7052_s6, 512 }
  0x45   :  { %s74_s11 = sshll.u32 %s6318_s10, 4  ;;  %p6261_p4 = scmp.ne.s32.totalorder %s7052_s6, %s6260_s15  ;;  %s75_s11 = int_to_ptr.vmem [resolvable:$true] %s74_s11 }
  0x46   :  { %p6264_p5 = scmp.lt.u32.totalorder %s6260_s15, %s7052_s6 }
  0x48   :  { %p6266_p6 = pnand %p6264_p5, %p6261_p4 }
  0x4a   :  { %6269 = shalt.err (!%p6266_p6)
}
  0x4b   :  { %s6270_s5 = scalar_lea.vmem %s75_s11, 512  ;;  %p6275_p8 = scmp.lt.s32.totalorder %s75_s11, %s75_s11 }
  0x4c   :  { %p6271_p7 = scmp.ne.s32.totalorder %s75_s11, %s6270_s5  ;;  %p6276_p9 = scmp.lt.s32.totalorder %s6270_s5, %s6270_s5 }
  0x4e   :  { %p6277_p10 = por %p6276_p9, %p6275_p8 }
  0x50   :  { %p6278_p11 = pnand %p6277_p10, %p6271_p7 }
  0x52   :  { %6281 = shalt.err (!%p6278_p11)
}
  0x53   :  { %80 = dma.hbm_to_vmem [thread:$0]  %s7052_s6, 512, %s75_s11, [#allocation9], %s6314_s17, %s6314_s17, %s6315_s18  }
  0x54   :  { %6304 = dma.done.wait [#allocation3], 256  }
  0x55   :  { %6305 = vsyncadd [#allocation3], 4294967040 }
  0x56   :  { %6306 = dma.done.wait [#allocation6], 768  }
  0x57   :  { %6307 = vsyncadd [#allocation6], 4294966528 }
  0x58   :  { %6308 = dma.done.wait [#allocation9], 1024  }
  0x59   :  { %6309 = vsyncadd [#allocation9], 4294966272  ;;  %vm104_vm0 = vcmask 261120   ;;  %v100_v0 = vld [vmem:[#allocation5] sm:$0xff]  ;;  %v101_v1 = vld [vmem:[#allocation5 + $0x8] sm:$0xff]  ;;  %s6322_s24 = smov 104  }
  0x5a   :  { %v148_v2 = vsel %vm104_vm0, %v100_v0, 0.0  ;;  %v151_v3 = vsel %vm104_vm0, %v101_v1, 0.0  ;;  %v98_v4 = vld [vmem:[#allocation2] sm:$0xff]  ;;  %v99_v17 = vld [vmem:[#allocation2 + $0x8] sm:$0xff]  ;;  %v265_v26 = vld [vmem:[#allocation8 + $0x10] sm:$0xff]  ;;  %vm6325_vm1 = vmmov 0  }
  0x5b   :  { %149 = vadd.xlane.f32.xlu0 %v148_v2  ;;  %v105_v5 = vsel %vm104_vm0, %v98_v4, 0.0  ;;  %v108_v20 = vsel %vm104_vm0, %v99_v17, 0.0  ;;  %v263_v23 = vld [vmem:[#allocation8] sm:$0xff]  ;;  %v264_v24 = vld [vmem:[#allocation8 + $0x8] sm:$0xff]  ;;  %v266_v27 = vld [vmem:[#allocation8 + $0x18] sm:$0xff]  ;;  %s6326_s25 = smov 96  }
  0x5c   :  { %v6091_v25 = vpack.c.bf16 %v264_v24, %v263_v23  ;;  %v6095_v28 = vpack.c.bf16 %v266_v27, %v265_v26  ;;  %v5864_v42 = vld [vmem:[%s7048_s2] ss:$0 sm:$0xff]  ;;  %v179_v58 = vld [vmem:[#allocation7 + $0x8] sm:$0xff]  ;;  %v180_v59 = vld [vmem:[#allocation7 + $0x10] sm:$0xff]  ;;  %s6320_s2 = smov 112   ;;  %vm1604_vm2 = vcmask 64512  }
  0x5d   :  { %v5865_v46 = vld [vmem:[%s7049_s3] ss:$0 sm:$0xff]  ;;  %v181_v61 = vld [vmem:[#allocation7 + $0x18] sm:$0xff]  ;;  %s6321_s3 = smov 120   ;;  %s6328_s26 = smov 24   ;;  %vm3246_vm3 = vcmask 130048  }
  0x5e   :  { %6092 = vmatprep.subr.bf16.mxu1 %v6091_v25  ;;  %v178_v57 = vld [vmem:[#allocation7] sm:$0xff]  ;;  %v6087_v62 = vpack.c.bf16 %v181_v61, %v180_v59  ;;  %s6329_s27 = smov 16   ;;  %vm3248_vm4 = vcmask 195584   ;;  %s6330_s9 = smov [#allocation11]  }
  0x5f   :  { %152 = vadd.xlane.f32.xlu0 %v151_v3  ;;  %6094 = vmatpush3.bf16.msra.mxu1 %v6091_v25  ;;  %v6083_v60 = vpack.c.bf16 %v179_v58, %v178_v57  ;;  %s5850_s10 = sshll.u32 %s6330_s9, 4  ;;  %s5851_s10 = int_to_ptr.vmem [resolvable:$true] %s5850_s10 }
  0x60   :  { %6096 = vmatprep.subr.bf16.mxu1 %v6095_v28  ;;  %s6282_s11 = scalar_lea.vmem %s5851_s10, 256  ;;  %p6287_p13 = scmp.lt.s32.totalorder %s5851_s10, %s5851_s10 }
  0x61   :  { %6084 = vmatprep.subr.bf16.mxu0 %v6083_v60  ;;  %p6283_p12 = scmp.ne.s32.totalorder %s5851_s10, %s6282_s11  ;;  %p6288_p0 = scmp.lt.s32.totalorder %s6282_s11, %s6282_s11 }
  0x62   :  { %6086 = vmatpush3.bf16.msra.mxu0 %v6083_v60 }
  0x63   :  { %106 = vadd.xlane.f32.xlu0 %v105_v5  ;;  %6098 = vmatpush3.bf16.msra.mxu1 %v6095_v28  ;;  %p6289_p1 = por %p6288_p0, %p6287_p13 }
  0x64   :  { %6088 = vmatprep.subr.bf16.mxu0 %v6087_v62 }
  0x65   :  { %p6290_p2 = pnand %p6289_p1, %p6283_p12 }
  0x66   :  { %6090 = vmatpush3.bf16.msra.mxu0 %v6087_v62 }
  0xe8   :  { %v150_v6 = vpop.xlane.xlu0 %149 }
  0xe9   :  { %v154_v7 = vmul.f32 0.03125, %v150_v6 }
  0xeb   :  { %v156_v8 = vsub.f32 %v100_v0, %v154_v7 }
  0xec   :  { %v153_v9 = vpop.xlane.xlu0 %152 }
  0xed   :  { %v155_v10 = vmul.f32 0.03125, %v153_v9  ;;  %v158_v11 = vmul.f32 %v156_v8, %v156_v8  ;;  %v6323_v9 = vmov 1983009808  }
  0xef   :  { %v157_v12 = vsub.f32 %v101_v1, %v155_v10  ;;  %v160_v13 = vsel %vm104_vm0, %v158_v11, 0.0  ;;  %v371_v10 = vunpack.c.l.s4 %v6323_v9  ;;  %v373_v11 = vlaneseq }
  0xf0   :  { %161 = vadd.xlane.f32.xlu1 %v160_v13  ;;  %v107_v14 = vpop.xlane.xlu0 %106 }
  0xf1   :  { %v112_v15 = vmul.f32 0.03125, %v107_v14  ;;  %v159_v16 = vmul.f32 %v157_v12, %v157_v12  ;;  %v374_v13 = vshrl.u32 %v373_v11, 7  ;;  %v6324_v14 = vmov 1934713408  }
  0xf3   :  { %v114_v18 = vsub.f32 %v98_v4, %v112_v15  ;;  %v163_v19 = vsel %vm104_vm0, %v159_v16, 0.0  ;;  %v403_v15 = vunpack.c.l.s4 %v6324_v14 }
  0xf4   :  { %164 = vadd.xlane.f32.xlu1 %v163_v19 }
  0xf5   :  { %v116_v21 = vmul.f32 %v114_v18, %v114_v18  ;;  %v404_v19 = vunpack.c.0.s8 %v403_v15 }
  0xf7   :  { %v118_v22 = vsel %vm104_vm0, %v116_v21, 0.0  ;;  %v6511_v25 = vsub.s32 %v404_v19, %v374_v13 }
  0xf8   :  { %109 = vadd.xlane.f32.xlu1 %v108_v20  ;;  %119 = vadd.xlane.f32.xlu0 %v118_v22 }
 0x17d   :  { %v162_v29 = vpop.xlane.xlu1 %161 }
 0x17e   :  { %v166_v30 = vmul.f32 0.03125, %v162_v29 }
 0x180   :  { %v168_v31 = vadd.f32 1e-05, %v166_v30 }
 0x181   :  { %v165_v32 = vpop.xlane.xlu1 %164 }
 0x182   :  { %6130 = vrsqrt.f32 %v168_v31  ;;  %v167_v33 = vmul.f32 0.03125, %v165_v32 }
 0x184   :  { %v169_v34 = vadd.f32 1e-05, %v167_v33 }
 0x185   :  { %v110_v35 = vpop.xlane.xlu1 %109  ;;  %v120_v36 = vpop.xlane.xlu0 %119 }
 0x186   :  { %6132 = vrsqrt.f32 %v169_v34  ;;  %v113_v37 = vmul.f32 0.03125, %v110_v35  ;;  %v124_v38 = vmul.f32 0.03125, %v120_v36 }
 0x188   :  { %v115_v39 = vsub.f32 %v99_v17, %v113_v37  ;;  %v126_v40 = vadd.f32 1e-05, %v124_v38 }
 0x18a   :  { %6134 = vrsqrt.f32 %v126_v40  ;;  %v117_v41 = vmul.f32 %v115_v39, %v115_v39 }
 0x18c   :  { %v6131_v43 = vpop.eup %6130  ;;  %v121_v44 = vsel %vm104_vm0, %v117_v41, 0.0 }
 0x18d   :  { %122 = vadd.xlane.f32.xlu1 %v121_v44  ;;  %v172_v45 = vmul.f32 %v6131_v43, %v5864_v42 }
 0x18f   :  { %v174_v47 = vmul.f32 %v172_v45, %v156_v8  ;;  %v6319_v8 = vmov 0.0  }
 0x190   :  { %v6133_v48 = vpop.eup %6132  ;;  %5981 = vmatprep.subr.mxu1 %v6319_v8  ;;  %5991 = vmatprep.subr.mxu0 %v6319_v8 }
 0x191   :  { %v176_v49 = vadd.f32 %v5865_v46, %v174_v47  ;;  %v173_v50 = vmul.f32 %v6133_v48, %v5864_v42 }
 0x193   :  { %5978 = vmatprep.mubr.msk.f32.mxu1 %vm104_vm0, %v176_v49  ;;  %v175_v51 = vmul.f32 %v173_v50, %v157_v12  ;;  %v372_v12 = vunpack.c.0.s8 %v371_v10 }
 0x194   :  { %v6135_v52 = vpop.eup %6134 }
 0x195   :  { %v177_v53 = vadd.f32 %v5865_v46, %v175_v51  ;;  %v136_v54 = vmul.f32 %v6135_v52, %v5864_v42 }
 0x197   :  { %5979 = vmatmul.mubr.msk.f32.vlgmr.msra.gmra.mrb[0].mxu1 %vm104_vm0, %v177_v53  ;;  %v138_v55 = vmul.f32 %v136_v54, %v114_v18  ;;  %v6499_v18 = vsub.s32 %v372_v12, %v374_v13 }
 0x198   :  { %5983 = vmatprep.mubr.msk.f32.mxu1 %vm6325_vm1, %v6319_v8 }
 0x199   :  { %v146_v56 = vadd.f32 %v5865_v46, %v138_v55 }
 0x19b   :  { %5967 = vmatprep.mubr.msk.f32.mxu0 %vm104_vm0, %v146_v56 }
 0x21a   :  { %v123_v63 = vpop.xlane.xlu1 %122 }
 0x21b   :  { %v125_v0 = vmul.f32 0.03125, %v123_v63 }
 0x21d   :  { %v127_v1 = vadd.f32 1e-05, %v125_v0 }
 0x21f   :  { %6136 = vrsqrt.f32 %v127_v1 }
 0x229   :  { %v6137_v2 = vpop.eup %6136 }
 0x22a   :  { %v137_v3 = vmul.f32 %v6137_v2, %v5864_v42 }
 0x22c   :  { %v139_v4 = vmul.f32 %v137_v3, %v115_v39 }
 0x22e   :  { %v147_v5 = vadd.f32 %v5865_v46, %v139_v4 }
 0x230   :  { %5968 = vmatmul.mubr.msk.f32.vlgmr.msra.gmra.mrb[0].mxu0 %vm104_vm0, %v147_v5 }
 0x231   :  { %5993 = vmatprep.mubr.msk.f32.mxu0 %vm6325_vm1, %v6319_v8 }
 0x26a   :  { %v6483_v6 = vpop.f32.mrb[0].mxu1 }
 0x26b   :  { %v6485_v7 = vpop.f32.mrb[1].mxu1 }
 0x26c   :  { %512 = vrot.lane.b32.xlu1 %v6485_v7, %s6320_s2  ;;  %506 = vrot.lane.b32.xlu0 %v6485_v7, %s6321_s3 }
 0x270   :  { %518 = vrot.lane.b32.xlu1 %v6485_v7, %s6322_s24 }
 0x2de   :  { %v6495_v16 = vpop.permute.xlu1 %512  ;;  %v6501_v20 = vpop.permute.xlu0 %506 }
 0x2df   :  { %v524_v17 = vcombine.low %v6485_v7, %v6495_v16  ;;  %v525_v22 = vcombine.high %v6485_v7, %v6495_v16 }
 0x2e1   :  { %v532_v26 = vrot.slane %v524_v17, %v6499_v18  ;;  %v539_v30 = vrot.slane %v525_v22, %v6499_v18 }
 0x2e2   :  { %v6503_v21 = vpop.permute.xlu1 %518 }
 0x2e3   :  { %v540_v23 = vcombine.low %v6501_v20, %v6503_v21  ;;  %v541_v24 = vcombine.high %v6501_v20, %v6503_v21 }
 0x2e5   :  { %v548_v27 = vrot.slane %v540_v23, %v6499_v18  ;;  %v555_v28 = vrot.slane %v541_v24, %v6499_v18 }
 0x2e7   :  { %v557_v29 = vcombine.high %v532_v26, %v548_v27  ;;  %v572_v32 = vcombine.low %v539_v30, %v555_v28  ;;  %v573_v34 = vcombine.high %v539_v30, %v555_v28  ;;  %v556_v35 = vcombine.low %v532_v26, %v548_v27 }
 0x2e9   :  { %v571_v31 = vrot.slane %v557_v29, %v6511_v25  ;;  %v580_v33 = vrot.slane %v572_v32, %v6511_v25  ;;  %v587_v36 = vrot.slane %v573_v34, %v6511_v25  ;;  %v564_v37 = vrot.slane %v556_v35, %v6511_v25 }
 0x2eb   :  { %952 = vxpose.xlu0.b32.start.end [1/1] (short) (narrow) %v571_v31, 8  ;;  %v588_v38 = vcombine.high %v564_v37, %v6319_v8  ;;  %v589_v39 = vcombine.high %v571_v31, %v6319_v8  ;;  %v590_v42 = vcombine.high %v580_v33, %v6319_v8  ;;  %v591_v43 = vcombine.high %v587_v36, %v6319_v8 }
 0x2ef   :  { %1016 = vxpose.xlu0.b32.start.end [1/1] (short) (narrow) %v580_v33, 8 }
 0x2f3   :  { %1080 = vxpose.xlu0.b32.start.end [1/1] (short) (narrow) %v587_v36, 8 }
 0x2f7   :  { %920 = vxpose.xlu0.b32.start.end [1/1] (short) (narrow) %v588_v38, 8 }
 0x2fb   :  { %984 = vxpose.xlu0.b32.start.end [1/1] (short) (narrow) %v589_v39, 8 }
 0x303   :  { %v6523_v40 = vpop.f32.mrb[0].mxu0 }
 0x304   :  { %v6525_v41 = vpop.f32.mrb[1].mxu0 }
 0x305   :  { %356 = vrot.lane.b32.xlu1 %v6525_v41, %s6320_s2 }
 0x324   :  { %350 = vrot.lane.b32.xlu0 %v6525_v41, %s6321_s3 }
 0x32e   :  { %888 = vxpose.xlu1.b32.start.end [1/1] (short) (narrow) %v564_v37, 8 }
 0x332   :  { %1048 = vxpose.xlu1.b32.start.end [1/1] (short) (narrow) %v590_v42, 8 }
 0x336   :  { %1112 = vxpose.xlu1.b32.start.end [1/1] (short) (narrow) %v591_v43, 8 }
 0x354   :  { %362 = vrot.lane.b32.xlu1 %v6525_v41, %s6322_s24 }
 0x36b   :  { %v968_v44 = vpop.trf.xlu0 }
 0x36f   :  { %v1032_v45 = vpop.trf.xlu0 }
 0x373   :  { %v1096_v46 = vpop.trf.xlu0 }
 0x374   :  { %v1176_v54 = vcombine.low %v1032_v45, %v1096_v46  ;;  %v1177_v55 = vcombine.high %v1032_v45, %v1096_v46 }
 0x376   :  { %v1184_v63 = vrot.slane %v1176_v54, %v6499_v18  ;;  %v1191_v0 = vrot.slane %v1177_v55, %v6499_v18 }
 0x377   :  { %v6535_v47 = vpop.permute.xlu1 %356  ;;  %v936_v48 = vpop.trf.xlu0 }
 0x378   :  { %v368_v43 = vcombine.low %v6525_v41, %v6535_v47 }
 0x37a   :  { %v376_v45 = vrot.slane %v368_v43, %v6499_v18 }
 0x37b   :  { %v1000_v50 = vpop.trf.xlu0 }
 0x37c   :  { %v1160_v51 = vcombine.low %v936_v48, %v1000_v50  ;;  %v1161_v56 = vcombine.high %v936_v48, %v1000_v50 }
 0x37e   :  { %v1168_v57 = vrot.slane %v1160_v51, %v6499_v18  ;;  %v1175_v1 = vrot.slane %v1161_v56, %v6499_v18 }
 0x396   :  { %v351_v38 = vpop.permute.xlu0 %350 }
 0x3ae   :  { %v904_v49 = vpop.trf.xlu1 }
 0x3af   :  { %v1144_v52 = vcombine.low %v904_v49, %v968_v44  ;;  %v1145_v58 = vcombine.high %v904_v49, %v968_v44  ;;  %v369_v44 = vcombine.high %v6525_v41, %v6535_v47 }
 0x3b1   :  { %v1152_v59 = vrot.slane %v1144_v52, %v6499_v18  ;;  %v1159_v2 = vrot.slane %v1145_v58, %v6499_v18 }
 0x3b2   :  { %v1064_v53 = vpop.trf.xlu1 }
 0x3b3   :  { %v1208_v3 = vcombine.low %v1152_v59, %v1168_v57  ;;  %v1209_v14 = vcombine.high %v1152_v59, %v1168_v57  ;;  %v1224_v15 = vcombine.low %v1159_v2, %v1175_v1  ;;  %v1225_v28 = vcombine.high %v1159_v2, %v1175_v1 }
 0x3b5   :  { %v1216_v12 = vrot.slane %v1208_v3, %v6511_v25  ;;  %v1223_v26 = vrot.slane %v1209_v14, %v6511_v25  ;;  %v1232_v27 = vrot.slane %v1224_v15, %v6511_v25  ;;  %v1239_v32 = vrot.slane %v1225_v28, %v6511_v25 }
 0x3b6   :  { %v1128_v60 = vpop.trf.xlu1 }
 0x3b7   :  { %v1192_v61 = vcombine.low %v1064_v53, %v1128_v60  ;;  %v1193_v62 = vcombine.high %v1064_v53, %v1128_v60 }
 0x3b9   :  { %v1200_v4 = vrot.slane %v1192_v61, %v6499_v18  ;;  %v1207_v5 = vrot.slane %v1193_v62, %v6499_v18 }
 0x3bb   :  { %v1240_v9 = vcombine.low %v1184_v63, %v1200_v4  ;;  %v1241_v10 = vcombine.high %v1184_v63, %v1200_v4  ;;  %v1256_v11 = vcombine.low %v1191_v0, %v1207_v5  ;;  %v1257_v17 = vcombine.high %v1191_v0, %v1207_v5 }
 0x3bd   :  { %v1248_v13 = vrot.slane %v1240_v9, %v6511_v25  ;;  %v1255_v23 = vrot.slane %v1241_v10, %v6511_v25  ;;  %v1264_v24 = vrot.slane %v1256_v11, %v6511_v25  ;;  %v1271_v31 = vrot.slane %v1257_v17, %v6511_v25 }
 0x3bf   :  { %v1273_v19 = vcombine.high %v1216_v12, %v1248_v13  ;;  %v1272_v22 = vcombine.low %v1216_v12, %v1248_v13  ;;  %v1274_v29 = vcombine.low %v1223_v26, %v1255_v23  ;;  %v1276_v30 = vcombine.low %v1232_v27, %v1264_v24 }
 0x3c0   :  { %v1275_v33 = vcombine.high %v1223_v26, %v1255_v23  ;;  %v1278_v34 = vcombine.low %v1239_v32, %v1271_v31  ;;  %v1277_v35 = vcombine.high %v1232_v27, %v1264_v24  ;;  %v1279_v36 = vcombine.high %v1239_v32, %v1271_v31 }
 0x3c1   :  { %1312 = vxpose.xlu0.b32.start.end [1/1] (short) (narrow) %v1273_v19, 8  ;;  %1280 = vxpose.xlu1.b32.start.end [1/1] (short) (narrow) %v1272_v22, 8 }
 0x3c5   :  { %1344 = vxpose.xlu0.b32.start.end [1/1] (short) (narrow) %v1274_v29, 8  ;;  %1408 = vxpose.xlu1.b32.start.end [1/1] (short) (narrow) %v1276_v30, 8 }
 0x3c6   :  { %v363_v37 = vpop.permute.xlu1 %362 }
 0x3c7   :  { %v384_v39 = vcombine.low %v351_v38, %v363_v37  ;;  %v385_v42 = vcombine.high %v351_v38, %v363_v37 }
 0x3c9   :  { %1376 = vxpose.xlu0.b32.start.end [1/1] (short) (narrow) %v1275_v33, 8  ;;  %1472 = vxpose.xlu1.b32.start.end [1/1] (short) (narrow) %v1278_v34, 8 }
 0x3cd   :  { %1440 = vxpose.xlu0.b32.start.end [1/1] (short) (narrow) %v1277_v35, 8 }
 0x3d1   :  { %1504 = vxpose.xlu0.b32.start.end [1/1] (short) (narrow) %v1279_v36, 8 }
 0x3e7   :  { %664 = vrot.lane.b32.xlu1 %v6501_v20, %s6326_s25  ;;  %v392_v20 = vrot.slane %v384_v39, %v6499_v18 }
 0x3e9   :  { %v400_v48 = vcombine.low %v376_v45, %v392_v20  ;;  %v401_v49 = vcombine.high %v376_v45, %v392_v20 }
 0x3eb   :  { %668 = vrot.lane.b32.xlu1 %v6495_v16, %s6326_s25  ;;  %v399_v16 = vrot.slane %v385_v42, %v6499_v18  ;;  %v408_v54 = vrot.slane %v400_v48, %v6511_v25  ;;  %v415_v41 = vrot.slane %v401_v49, %v6511_v25 }
 0x3ed   :  { %v820_v57 = vcombine.low %v408_v54, %v415_v41  ;;  %v5870_v58 = vcombine.high %v408_v54, %v415_v41 }
 0x3ef   :  { %672 = vrot.lane.b32.xlu1 %v6503_v21, %s6326_s25  ;;  %v383_v21 = vrot.slane %v369_v44, %v6499_v18  ;;  %v827_v2 = vrot.slane %v820_v57, %v6499_v18  ;;  %v835_v3 = vrot.slane %v5870_v58, %v6499_v18 }
 0x3f1   :  { %v416_v50 = vcombine.low %v383_v21, %v399_v16  ;;  %v417_v51 = vcombine.high %v383_v21, %v399_v16  ;;  %v852_v14 = vcombine.low %v827_v2, %v835_v3  ;;  %v853_v15 = vcombine.high %v827_v2, %v835_v3 }
 0x3f3   :  { %v424_v47 = vrot.slane %v416_v50, %v6511_v25  ;;  %v431_v55 = vrot.slane %v417_v51, %v6511_v25  ;;  %v860_v28 = vrot.slane %v852_v14, %v6511_v25  ;;  %v867_v30 = vrot.slane %v853_v15, %v6511_v25 }
 0x3f5   :  { %v836_v59 = vcombine.low %v424_v47, %v431_v55  ;;  %v5871_v60 = vcombine.high %v424_v47, %v431_v55 }
 0x3f7   :  { %v843_v4 = vrot.slane %v836_v59, %v6499_v18  ;;  %v851_v5 = vrot.slane %v5871_v60, %v6499_v18 }
 0x3f9   :  { %v868_v17 = vcombine.low %v843_v4, %v851_v5  ;;  %v869_v19 = vcombine.high %v843_v4, %v851_v5 }
 0x3fa   :  { %660 = vrot.lane.b32.xlu0 %v6485_v7, %s6326_s25 }
 0x3fb   :  { %v876_v29 = vrot.slane %v868_v17, %v6511_v25  ;;  %v883_v31 = vrot.slane %v869_v19, %v6511_v25 }
 0x3fd   :  { %v884_v38 = vcombine.low %v860_v28, %v876_v29  ;;  %v886_v42 = vcombine.low %v867_v30, %v883_v31  ;;  %v885_v44 = vcombine.high %v860_v28, %v876_v29  ;;  %v887_v45 = vcombine.high %v867_v30, %v883_v31 }
 0x441   :  { %v1328_v46 = vpop.trf.xlu0  ;;  %v1296_v7 = vpop.trf.xlu1 }
 0x445   :  { %v1360_v52 = vpop.trf.xlu0  ;;  %v1424_v53 = vpop.trf.xlu1 }
 0x446   :  { %v1536_v62 = vcombine.low %v1296_v7, %v1360_v52 }
 0x448   :  { %v1543_v9 = vrot.slane %v1536_v62, %v6499_v18 }
 0x449   :  { %v1392_v56 = vpop.trf.xlu0  ;;  %v1488_v61 = vpop.trf.xlu1 }
 0x44a   :  { %v1544_v63 = vcombine.low %v1328_v46, %v1392_v56  ;;  %v1552_v1 = vcombine.low %v1424_v53, %v1488_v61 }
 0x44c   :  { %v1551_v10 = vrot.slane %v1544_v63, %v6499_v18  ;;  %v1559_v12 = vrot.slane %v1552_v1, %v6499_v18 }
 0x44d   :  { %v1456_v0 = vpop.trf.xlu0 }
 0x44e   :  { %v1568_v22 = vcombine.low %v1543_v9, %v1551_v10  ;;  %v1569_v23 = vcombine.high %v1543_v9, %v1551_v10 }
 0x450   :  { %v1576_v32 = vrot.slane %v1568_v22, %v6511_v25  ;;  %v1583_v33 = vrot.slane %v1569_v23, %v6511_v25 }
 0x451   :  { %v1520_v11 = vpop.trf.xlu0 }
 0x452   :  { %v1560_v13 = vcombine.low %v1456_v0, %v1520_v11 }
 0x454   :  { %v1567_v24 = vrot.slane %v1560_v13, %v6499_v18 }
 0x456   :  { %v1584_v26 = vcombine.low %v1559_v12, %v1567_v24  ;;  %v1585_v27 = vcombine.high %v1559_v12, %v1567_v24 }
 0x458   :  { %v1592_v34 = vrot.slane %v1584_v26, %v6511_v25  ;;  %v1599_v35 = vrot.slane %v1585_v27, %v6511_v25 }
 0x459   :  { %v665_v39 = vpop.permute.xlu1 %664 }
 0x45a   :  { %v1600_v36 = vcombine.low %v1576_v32, %v1592_v34  ;;  %v1602_v37 = vcombine.low %v1583_v33, %v1599_v35  ;;  %v1601_v43 = vcombine.high %v1576_v32, %v1592_v34  ;;  %v1603_v20 = vcombine.high %v1583_v33, %v1599_v35 }
 0x45c   :  { %5982 = vmatpush3.msra.mxu1 %v1600_v36  ;;  %5992 = vmatpush3.msra.mxu0 %v1602_v37 }
 0x45d   :  { %5984 = vmatmul.mubr.msk.f32.vlgmr.msra.gmra.mrb[2].mxu1 %vm1604_vm2, %v884_v38  ;;  %5986 = vmatprep.subr.mxu1 %v6319_v8  ;;  %v669_v16 = vpop.permute.xlu1 %668 }
 0x45e   :  { %5994 = vmatmul.mubr.msk.f32.vlgmr.msra.gmra.mrb[2].mxu0 %vm1604_vm2, %v886_v42  ;;  %5987 = vmatpush3.msra.mxu1 %v1601_v43 }
 0x45f   :  { %5988 = vmatprep.mubr.msk.f32.mxu1 %vm6325_vm1, %v6319_v8  ;;  %5996 = vmatprep.subr.mxu1 %v6319_v8 }
 0x460   :  { %6001 = vmatprep.subr.mxu0 %v6319_v8  ;;  %6003 = vmatprep.mubr.msk.f32.mxu0 %vm6325_vm1, %v6319_v8 }
 0x461   :  { %5989 = vmatmul.mubr.msk.f32.vlgmr.msra.gmra.mrb[4].mxu1 %vm1604_vm2, %v885_v44  ;;  %v673_v21 = vpop.permute.xlu1 %672 }
 0x462   :  { %5997 = vmatpush3.msra.mxu1 %v1603_v20  ;;  %5998 = vmatprep.mubr.msk.f32.mxu1 %vm6325_vm1, %v6319_v8  ;;  %v700_v46 = vcombine.low %v665_v39, %v673_v21  ;;  %v701_v7 = vcombine.high %v665_v39, %v673_v21 }
 0x463   :  { %6006 = vmatprep.subr.mxu1 %v6319_v8 }
 0x464   :  { %v708_v51 = vrot.slane %v700_v46, %v6499_v18  ;;  %v715_v52 = vrot.slane %v701_v7, %v6499_v18 }
 0x465   :  { %5999 = vmatmul.mubr.msk.f32.vlgmr.msra.gmra.mrb[6].mxu1 %vm1604_vm2, %v887_v45 }
 0x466   :  { %6008 = vmatprep.mubr.msk.f32.mxu1 %vm6325_vm1, %v6319_v8 }
 0x46c   :  { %v661_v48 = vpop.permute.xlu0 %660 }
 0x46d   :  { %v684_v49 = vcombine.low %v661_v48, %v669_v16  ;;  %v685_v50 = vcombine.high %v661_v48, %v669_v16 }
 0x46f   :  { %v692_v53 = vrot.slane %v684_v49, %v6499_v18  ;;  %v699_v54 = vrot.slane %v685_v50, %v6499_v18 }
 0x471   :  { %v716_v41 = vcombine.low %v692_v53, %v708_v51  ;;  %v733_v47 = vcombine.high %v699_v54, %v715_v52  ;;  %v717_v57 = vcombine.high %v692_v53, %v708_v51  ;;  %v732_v60 = vcombine.low %v699_v54, %v715_v52 }
 0x473   :  { %v747_v55 = vrot.slane %v733_v47, %v6511_v25  ;;  %v724_v56 = vrot.slane %v716_v41, %v6511_v25  ;;  %v731_v58 = vrot.slane %v717_v57, %v6511_v25  ;;  %v740_v61 = vrot.slane %v732_v60, %v6511_v25 }
 0x475   :  { %2141 = vxpose.xlu1.b32.start.end [1/1] (short) (narrow) %v747_v55, 8  ;;  %1949 = vxpose.xlu0.b32.start.end [1/1] (short) (narrow) %v724_v56, 8  ;;  %v748_v59 = vcombine.high %v724_v56, %v6319_v8  ;;  %v749_v62 = vcombine.high %v731_v58, %v6319_v8  ;;  %v750_v63 = vcombine.high %v740_v61, %v6319_v8 }
 0x476   :  { %v751_v0 = vcombine.high %v747_v55, %v6319_v8 }
 0x479   :  { %2013 = vxpose.xlu0.b32.start.end [1/1] (short) (narrow) %v731_v58, 8  ;;  %1981 = vxpose.xlu1.b32.start.end [1/1] (short) (narrow) %v748_v59, 8 }
 0x47d   :  { %2077 = vxpose.xlu0.b32.start.end [1/1] (short) (narrow) %v740_v61, 8 }
 0x481   :  { %2045 = vxpose.xlu0.b32.start.end [1/1] (short) (narrow) %v749_v62, 8 }
 0x485   :  { %2109 = vxpose.xlu0.b32.start.end [1/1] (short) (narrow) %v750_v63, 8 }
 0x489   :  { %2173 = vxpose.xlu0.b32.start.end [1/1] (short) (narrow) %v751_v0, 8 }
 0x4f5   :  { %v1965_v1 = vpop.trf.xlu0  ;;  %v2157_v3 = vpop.trf.xlu1 }
 0x4f9   :  { %v2029_v2 = vpop.trf.xlu0  ;;  %v1997_v10 = vpop.trf.xlu1 }
 0x4fa   :  { %v2206_v4 = vcombine.high %v1965_v1, %v2029_v2  ;;  %v2205_v19 = vcombine.low %v1965_v1, %v2029_v2 }
 0x4fc   :  { %v2220_v13 = vrot.slane %v2206_v4, %v6499_v18  ;;  %v2213_v28 = vrot.slane %v2205_v19, %v6499_v18 }
 0x4fd   :  { %v2093_v5 = vpop.trf.xlu0 }
 0x4fe   :  { %v2238_v9 = vcombine.high %v2093_v5, %v2157_v3  ;;  %v2237_v24 = vcombine.low %v2093_v5, %v2157_v3 }
 0x500   :  { %v2245_v31 = vrot.slane %v2237_v24, %v6499_v18  ;;  %v2252_v32 = vrot.slane %v2238_v9, %v6499_v18 }
 0x501   :  { %v2061_v11 = vpop.trf.xlu0 }
 0x502   :  { %v2222_v12 = vcombine.high %v1997_v10, %v2061_v11  ;;  %v2221_v14 = vcombine.low %v1997_v10, %v2061_v11 }
 0x504   :  { %v2236_v15 = vrot.slane %v2222_v12, %v6499_v18  ;;  %v2229_v26 = vrot.slane %v2221_v14, %v6499_v18 }
 0x505   :  { %v2125_v17 = vpop.trf.xlu0 }
 0x506   :  { %v2285_v22 = vcombine.low %v2220_v13, %v2236_v15  ;;  %v2286_v23 = vcombine.high %v2220_v13, %v2236_v15  ;;  %v2269_v35 = vcombine.low %v2213_v28, %v2229_v26  ;;  %v2270_v42 = vcombine.high %v2213_v28, %v2229_v26 }
 0x508   :  { %v2277_v43 = vrot.slane %v2269_v35, %v6511_v25  ;;  %v2293_v45 = vrot.slane %v2285_v22, %v6511_v25  ;;  %v6637_v21 = vrot.slane %v2286_v23, %v6511_v25  ;;  %v2284_v53 = vrot.slane %v2270_v42, %v6511_v25 }
 0x509   :  { %v2189_v27 = vpop.trf.xlu0 }
 0x50a   :  { %v2253_v29 = vcombine.low %v2125_v17, %v2189_v27  ;;  %v2254_v30 = vcombine.high %v2125_v17, %v2189_v27 }
 0x50c   :  { %v2261_v33 = vrot.slane %v2253_v29, %v6499_v18  ;;  %v2268_v34 = vrot.slane %v2254_v30, %v6499_v18 }
 0x50e   :  { %v2317_v36 = vcombine.low %v2252_v32, %v2268_v34  ;;  %v2318_v37 = vcombine.high %v2252_v32, %v2268_v34  ;;  %v2301_v38 = vcombine.low %v2245_v31, %v2261_v33  ;;  %v2302_v39 = vcombine.high %v2245_v31, %v2261_v33 }
 0x510   :  { %v2309_v44 = vrot.slane %v2301_v38, %v6511_v25  ;;  %v2325_v20 = vrot.slane %v2317_v36, %v6511_v25  ;;  %v6633_v16 = vrot.slane %v2318_v37, %v6511_v25  ;;  %v2316_v48 = vrot.slane %v2302_v39, %v6511_v25 }
 0x512   :  { %v2334_v46 = vcombine.high %v2277_v43, %v2309_v44  ;;  %v2333_v7 = vcombine.low %v2277_v43, %v2309_v44  ;;  %v2337_v49 = vcombine.low %v2293_v45, %v2325_v20  ;;  %v2338_v50 = vcombine.high %v2293_v45, %v2325_v20 }
 0x513   :  { %v2339_v51 = vcombine.low %v6637_v21, %v6633_v16  ;;  %v2340_v52 = vcombine.high %v6637_v21, %v6633_v16  ;;  %v2335_v54 = vcombine.low %v2284_v53, %v2316_v48  ;;  %v2336_v41 = vcombine.high %v2284_v53, %v2316_v48 }
 0x514   :  { %2373 = vxpose.xlu1.b32.start.end [1/1] (short) (narrow) %v2334_v46, 8  ;;  %2341 = vxpose.xlu0.b32.start.end [1/1] (short) (narrow) %v2333_v7, 8 }
 0x518   :  { %2405 = vxpose.xlu0.b32.start.end [1/1] (short) (narrow) %v2335_v54, 8 }
 0x51c   :  { %2437 = vxpose.xlu0.b32.start.end [1/1] (short) (narrow) %v2336_v41, 8 }
 0x530   :  { %v1674_v47 = vpop.f32.mrb[2].mxu1 }
 0x531   :  { %v1820_v55 = vpop.f32.mrb[2].mxu0  ;;  %v5985_v56 = vpop.f32.mrb[3].mxu1  ;;  %v1897_v60 = vmul.f32 0.35355338, %v1674_v47 }
 0x532   :  { %v5995_v57 = vpop.f32.mrb[3].mxu0  ;;  %v1899_v63 = vmul.f32 0.35355338, %v1820_v55 }
 0x533   :  { %v1901_v0 = vsel %vm1604_vm2, %v1897_v60, -inf }
 0x534   :  { %v1747_v58 = vpop.f32.mrb[4].mxu1  ;;  %v1907_v2 = vsel %vm1604_vm2, %v1899_v63, -inf }
 0x535   :  { %v5990_v59 = vpop.f32.mrb[5].mxu1  ;;  %v1898_v4 = vmul.f32 0.35355338, %v1747_v58 }
 0x537   :  { %v1904_v5 = vsel %vm1604_vm2, %v1898_v4, -inf }
 0x538   :  { %v1893_v61 = vpop.f32.mrb[6].mxu1 }
 0x539   :  { %v6000_v62 = vpop.f32.mrb[7].mxu1  ;;  %v1900_v1 = vmul.f32 0.35355338, %v1893_v61 }
 0x53b   :  { %1902 = vmax.xlane.f32.xlu1 %v1901_v0  ;;  %v1910_v3 = vsel %vm1604_vm2, %v1900_v1, -inf }
 0x53f   :  { %1908 = vmax.xlane.f32.xlu1 %v1907_v2 }
 0x543   :  { %1911 = vmax.xlane.f32.xlu1 %v1910_v3 }
 0x549   :  { %1905 = vmax.xlane.f32.xlu0 %v1904_v5 }
 0x576   :  { %2469 = vxpose.xlu1.b32.start.end [1/1] (short) (narrow) %v2337_v49, 8  ;;  %2501 = vxpose.xlu0.b32.start.end [1/1] (short) (narrow) %v2338_v50, 8 }
 0x594   :  { %v2357_v9 = vpop.trf.xlu0  ;;  %v2389_v12 = vpop.trf.xlu1 }
 0x598   :  { %v2421_v10 = vpop.trf.xlu0 }
 0x599   :  { %v2597_v11 = vcombine.low %v2357_v9, %v2421_v10 }
 0x59b   :  { %v6650_v14 = vrot.slane %v2597_v11, %v6499_v18 }
 0x59c   :  { %v2453_v13 = vpop.trf.xlu0 }
 0x59d   :  { %v2605_v15 = vcombine.low %v2389_v12, %v2453_v13 }
 0x59f   :  { %v6653_v17 = vrot.slane %v2605_v15, %v6499_v18 }
 0x5a1   :  { %v2629_v19 = vcombine.low %v6650_v14, %v6653_v17  ;;  %v2630_v22 = vcombine.high %v6650_v14, %v6653_v17 }
 0x5a3   :  { %v2637_v61 = vrot.slane %v2629_v19, %v6511_v25 }
 0x5c8   :  { %v1903_v23 = vpop.xlane.xlu1 %1902 }
 0x5c9   :  { %v1913_v24 = vsub.f32 %v1897_v60, %v1903_v23 }
 0x5cb   :  { %v1917_v26 = vmul.f32 1.442695, %v1913_v24 }
 0x5cc   :  { %v1909_v27 = vpop.xlane.xlu1 %1908 }
 0x5cd   :  { %6138 = vpow2.f32 %v1917_v26  ;;  %v1915_v28 = vsub.f32 %v1899_v63, %v1909_v27 }
 0x5cf   :  { %v1921_v29 = vmul.f32 1.442695, %v1915_v28 }
 0x5d0   :  { %v1912_v30 = vpop.xlane.xlu1 %1911 }
 0x5d1   :  { %6140 = vpow2.f32 %v1921_v29  ;;  %v1916_v31 = vsub.f32 %v1900_v1, %v1912_v30 }
 0x5d3   :  { %v1923_v32 = vmul.f32 1.442695, %v1916_v31 }
 0x5d5   :  { %6142 = vpow2.f32 %v1923_v32 }
 0x5d6   :  { %v1906_v33 = vpop.xlane.xlu0 %1905 }
 0x5d7   :  { %v6139_v34 = vpop.eup %6138  ;;  %v1914_v35 = vsub.f32 %v1898_v4, %v1906_v33  ;;  %v2644_v4 = vrot.slane %v2630_v22, %v6511_v25 }
 0x5d8   :  { %v1925_v36 = vsel %vm1604_vm2, %v6139_v34, 0.0 }
 0x5d9   :  { %v1919_v37 = vmul.f32 1.442695, %v1914_v35  ;;  %1926 = vadd.xlane.f32.xlu1 %v1925_v36 }
 0x5db   :  { %v6141_v38 = vpop.eup %6140  ;;  %6144 = vpow2.f32 %v1919_v37 }
 0x5dc   :  { %v1931_v39 = vsel %vm1604_vm2, %v6141_v38, 0.0 }
 0x5dd   :  { %1932 = vadd.xlane.f32.xlu1 %v1931_v39 }
 0x5df   :  { %v6143_v42 = vpop.eup %6142 }
 0x5e0   :  { %v1934_v43 = vsel %vm1604_vm2, %v6143_v42, 0.0 }
 0x5e1   :  { %1935 = vadd.xlane.f32.xlu1 %v1934_v43 }
 0x5e5   :  { %v6145_v44 = vpop.eup %6144 }
 0x5e6   :  { %v1928_v20 = vsel %vm1604_vm2, %v6145_v44, 0.0 }
 0x5e7   :  { %1929 = vadd.xlane.f32.xlu0 %v1928_v20 }
 0x5f6   :  { %v2485_v16 = vpop.trf.xlu1  ;;  %v2517_v21 = vpop.trf.xlu0 }
 0x614   :  { %2533 = vxpose.xlu1.b32.start.end [1/1] (short) (narrow) %v2339_v51, 8  ;;  %2565 = vxpose.xlu0.b32.start.end [1/1] (short) (narrow) %v2340_v52, 8 }
 0x632   :  { %508 = vrot.lane.b32.xlu1 %v6483_v6, %s6321_s3 }
 0x636   :  { %520 = vrot.lane.b32.xlu1 %v6483_v6, %s6322_s24 }
 0x63a   :  { %358 = vrot.lane.b32.xlu1 %v6523_v40, %s6320_s2 }
 0x63d   :  { %514 = vrot.lane.b32.xlu0 %v6483_v6, %s6320_s2 }
 0x63e   :  { %364 = vrot.lane.b32.xlu1 %v6523_v40, %s6322_s24 }
 0x641   :  { %352 = vrot.lane.b32.xlu0 %v6523_v40, %s6321_s3 }
 0x666   :  { %v1927_v45 = vpop.xlane.xlu1 %1926 }
 0x667   :  { %6146 = vrcp.f32 %v1927_v45 }
 0x66a   :  { %v1933_v51 = vpop.xlane.xlu1 %1932 }
 0x66e   :  { %v1936_v52 = vpop.xlane.xlu1 %1935 }
 0x671   :  { %v6147_v46 = vpop.eup %6146 }
 0x672   :  { %v1945_v7 = vmul.f32 %v6147_v46, %v6139_v34 }
 0x674   :  { %6002 = vmatpush3.xpose.msk.msra.mxu0 %vm1604_vm2, %v1945_v7  ;;  %v1930_v48 = vpop.xlane.xlu0 %1929 }
 0x675   :  { %6148 = vrcp.f32 %v1930_v48  ;;  %6011 = vmatprep.subr.mxu0 %v6319_v8 }
 0x676   :  { %6150 = vrcp.f32 %v1933_v51 }
 0x677   :  { %6152 = vrcp.f32 %v1936_v52 }
 0x67f   :  { %v6149_v49 = vpop.eup %6148 }
 0x680   :  { %v1946_v50 = vmul.f32 %v6149_v49, %v6145_v44  ;;  %v6151_v59 = vpop.eup %6150 }
 0x681   :  { %v6153_v60 = vpop.eup %6152  ;;  %v1947_v2 = vmul.f32 %v6151_v59, %v6141_v38 }
 0x682   :  { %6007 = vmatpush3.xpose.msk.msra.mxu1 %vm1604_vm2, %v1946_v50  ;;  %v1948_v3 = vmul.f32 %v6153_v60, %v6143_v42 }
 0x683   :  { %6016 = vmatprep.subr.mxu1 %v6319_v8 }
 0x694   :  { %v2549_v53 = vpop.trf.xlu1  ;;  %v2581_v54 = vpop.trf.xlu0 }
 0x695   :  { %v2613_v41 = vcombine.low %v2485_v16, %v2549_v53  ;;  %v2621_v47 = vcombine.low %v2517_v21, %v2581_v54 }
 0x697   :  { %v2620_v55 = vrot.slane %v2613_v41, %v6499_v18  ;;  %v2628_v56 = vrot.slane %v2621_v47, %v6499_v18 }
 0x699   :  { %v2645_v57 = vcombine.low %v2620_v55, %v2628_v56  ;;  %v2646_v58 = vcombine.high %v2620_v55, %v2628_v56 }
 0x69b   :  { %v2653_v62 = vrot.slane %v2645_v57, %v6511_v25  ;;  %v2660_v63 = vrot.slane %v2646_v58, %v6511_v25 }
 0x69d   :  { %v2661_v0 = vcombine.low %v2637_v61, %v2653_v62  ;;  %v2662_v1 = vcombine.high %v2637_v61, %v2653_v62  ;;  %v2663_v5 = vcombine.low %v2644_v4, %v2660_v63  ;;  %v2664_v9 = vcombine.high %v2644_v4, %v2660_v63 }
 0x69f   :  { %6004 = vmatmul.mubr.msk.f32.vlgmr.msra.gmra.mrb[4].mxu0 %vm1604_vm2, %v2661_v0  ;;  %6009 = vmatmul.mubr.msk.f32.vlgmr.msra.gmra.mrb[8].mxu1 %vm1604_vm2, %v2662_v1 }
 0x6a0   :  { %6012 = vmatpush3.xpose.msk.msra.mxu0 %vm1604_vm2, %v1947_v2  ;;  %6017 = vmatpush3.xpose.msk.msra.mxu1 %vm1604_vm2, %v1948_v3 }
 0x6a1   :  { %6013 = vmatprep.mubr.msk.f32.mxu0 %vm6325_vm1, %v6319_v8  ;;  %6018 = vmatprep.mubr.msk.f32.mxu1 %vm6325_vm1, %v6319_v8 }
 0x6a2   :  { %6032 = vmatprep.subr.mxu1 %v6319_v8 }
 0x6a3   :  { %6014 = vmatmul.mubr.msk.f32.vlgmr.msra.gmra.mrb[6].mxu0 %vm1604_vm2, %v2663_v5  ;;  %6019 = vmatmul.mubr.msk.f32.vlgmr.msra.gmra.mrb[10].mxu1 %vm1604_vm2, %v2664_v9 }
 0x6a4   :  { %v6708_v10 = vpop.permute.xlu1 %508  ;;  %6029 = vmatprep.mubr.msk.f32.mxu0 %vm6325_vm1, %v6319_v8  ;;  %6034 = vmatprep.mubr.msk.f32.mxu1 %vm6325_vm1, %v6319_v8 }
 0x6a8   :  { %v6714_v11 = vpop.permute.xlu1 %520 }
 0x6a9   :  { %v608_v15 = vcombine.low %v6708_v10, %v6714_v11  ;;  %v609_v26 = vcombine.high %v6708_v10, %v6714_v11 }
 0x6ab   :  { %v616_v23 = vrot.slane %v608_v15, %v6499_v18  ;;  %v623_v38 = vrot.slane %v609_v26, %v6499_v18 }
 0x6ac   :  { %v359_v12 = vpop.permute.xlu1 %358 }
 0x6ad   :  { %v436_v13 = vcombine.low %v6523_v40, %v359_v12  ;;  %v437_v14 = vcombine.high %v6523_v40, %v359_v12 }
 0x6af   :  { %v6720_v17 = vpop.permute.xlu0 %514  ;;  %v444_v31 = vrot.slane %v436_v13, %v6499_v18  ;;  %v451_v34 = vrot.slane %v437_v14, %v6499_v18 }
 0x6b0   :  { %v592_v19 = vcombine.low %v6483_v6, %v6720_v17  ;;  %v593_v22 = vcombine.high %v6483_v6, %v6720_v17  ;;  %v365_v27 = vpop.permute.xlu1 %364 }
 0x6b2   :  { %v600_v24 = vrot.slane %v592_v19, %v6499_v18  ;;  %v607_v33 = vrot.slane %v593_v22, %v6499_v18 }
 0x6b3   :  { %v353_v40 = vpop.permute.xlu0 %352 }
 0x6b4   :  { %v452_v28 = vcombine.low %v353_v40, %v365_v27  ;;  %v453_v29 = vcombine.high %v353_v40, %v365_v27  ;;  %v624_v30 = vcombine.low %v600_v24, %v616_v23  ;;  %v625_v32 = vcombine.high %v600_v24, %v616_v23 }
 0x6b5   :  { %v640_v45 = vcombine.low %v607_v33, %v623_v38  ;;  %v641_v41 = vcombine.high %v607_v33, %v623_v38 }
 0x6b6   :  { %v460_v35 = vrot.slane %v452_v28, %v6499_v18  ;;  %v467_v36 = vrot.slane %v453_v29, %v6499_v18  ;;  %v632_v37 = vrot.slane %v624_v30, %v6511_v25  ;;  %v639_v16 = vrot.slane %v625_v32, %v6511_v25 }
 0x6b7   :  { %v648_v54 = vrot.slane %v640_v45, %v6511_v25  ;;  %v655_v63 = vrot.slane %v641_v41, %v6511_v25 }
 0x6b8   :  { %v468_v39 = vcombine.low %v444_v31, %v460_v35  ;;  %v469_v42 = vcombine.high %v444_v31, %v460_v35  ;;  %v484_v43 = vcombine.low %v451_v34, %v467_v36  ;;  %v485_v44 = vcombine.high %v451_v34, %v467_v36  ;;  %3401 = vxpose.xlu0.b32.start.end [1/1] (short) (narrow) %v632_v37, 8 }
 0x6b9   :  { %v656_v20 = vcombine.high %v632_v37, %v6319_v8  ;;  %v657_v53 = vcombine.high %v639_v16, %v6319_v8  ;;  %v658_v62 = vcombine.high %v648_v54, %v6319_v8  ;;  %v659_v13 = vcombine.high %v655_v63, %v6319_v8 }
 0x6ba   :  { %v476_v21 = vrot.slane %v468_v39, %v6511_v25  ;;  %v483_v46 = vrot.slane %v469_v42, %v6511_v25  ;;  %v492_v7 = vrot.slane %v484_v43, %v6511_v25  ;;  %v499_v48 = vrot.slane %v485_v44, %v6511_v25 }
 0x6bb   :  { %3433 = vxpose.xlu1.b32.start.end [1/1] (short) (narrow) %v656_v20, 8 }
 0x6bc   :  { %v3333_v49 = vcombine.low %v476_v21, %v483_v46  ;;  %v5887_v50 = vcombine.high %v476_v21, %v483_v46  ;;  %v3349_v51 = vcombine.low %v492_v7, %v499_v48  ;;  %v5888_v52 = vcombine.high %v492_v7, %v499_v48  ;;  %3465 = vxpose.xlu0.b32.start.end [1/1] (short) (narrow) %v639_v16, 8 }
 0x6be   :  { %v3340_v47 = vrot.slane %v3333_v49, %v6499_v18  ;;  %v3348_v55 = vrot.slane %v5887_v50, %v6499_v18  ;;  %v3356_v56 = vrot.slane %v3349_v51, %v6499_v18  ;;  %v3364_v57 = vrot.slane %v5888_v52, %v6499_v18 }
 0x6bf   :  { %3497 = vxpose.xlu1.b32.start.end [1/1] (short) (narrow) %v657_v53, 8 }
 0x6c0   :  { %v3365_v58 = vcombine.low %v3340_v47, %v3348_v55  ;;  %v3366_v59 = vcombine.high %v3340_v47, %v3348_v55  ;;  %v3381_v60 = vcombine.low %v3356_v56, %v3364_v57  ;;  %v3382_v61 = vcombine.high %v3356_v56, %v3364_v57  ;;  %3529 = vxpose.xlu0.b32.start.end [1/1] (short) (narrow) %v648_v54, 8 }
 0x6c2   :  { %v6752_v0 = vrot.slane %v3365_v58, %v6511_v25  ;;  %v6755_v1 = vrot.slane %v3381_v60, %v6511_v25  ;;  %v6758_v2 = vrot.slane %v3366_v59, %v6511_v25  ;;  %v6761_v3 = vrot.slane %v3382_v61, %v6511_v25 }
 0x6c3   :  { %3561 = vxpose.xlu1.b32.start.end [1/1] (short) (narrow) %v658_v62, 8 }
 0x6c4   :  { %3593 = vxpose.xlu0.b32.start.end [1/1] (short) (narrow) %v655_v63, 8  ;;  %v3397_v4 = vcombine.low %v6752_v0, %v6755_v1  ;;  %v3399_v5 = vcombine.low %v6758_v2, %v6761_v3  ;;  %v3398_v9 = vcombine.high %v6752_v0, %v6755_v1  ;;  %v3400_v12 = vcombine.high %v6758_v2, %v6761_v3  ;;  %v3327_v0 = vld [vmem:[%s7053_s7] sm:$0xff] }
 0x6c5   :  { %vm3328_vm5 = vcmp.ge.f32.partialorder %v3327_v0, 0.1 }
 0x6c7   :  { %3625 = vxpose.xlu1.b32.start.end [1/1] (short) (narrow) %v659_v13, 8 }
 0x738   :  { %v3417_v14 = vpop.trf.xlu0 }
 0x73b   :  { %v3449_v15 = vpop.trf.xlu1 }
 0x73c   :  { %v3481_v19 = vpop.trf.xlu0 }
 0x73d   :  { %v3658_v22 = vcombine.high %v3417_v14, %v3481_v19  ;;  %v3657_v24 = vcombine.low %v3417_v14, %v3481_v19 }
 0x73f   :  { %v3513_v23 = vpop.trf.xlu1  ;;  %v3672_v40 = vrot.slane %v3658_v22, %v6499_v18  ;;  %v3665_v31 = vrot.slane %v3657_v24, %v6499_v18 }
 0x740   :  { %v3673_v26 = vcombine.low %v3449_v15, %v3513_v23  ;;  %v3674_v27 = vcombine.high %v3449_v15, %v3513_v23  ;;  %v3545_v28 = vpop.trf.xlu0 }
 0x742   :  { %v3688_v29 = vrot.slane %v3674_v27, %v6499_v18  ;;  %v3681_v30 = vrot.slane %v3673_v26, %v6499_v18  ;;  %v3250_v27 = vld [vmem:[#allocation10] sm:$0xff] }
 0x743   :  { %v3577_v32 = vpop.trf.xlu1 }
 0x744   :  { %v3738_v33 = vcombine.high %v3672_v40, %v3688_v29  ;;  %v3609_v34 = vpop.trf.xlu0  ;;  %v3721_v38 = vcombine.low %v3665_v31, %v3681_v30  ;;  %v3722_v20 = vcombine.high %v3665_v31, %v3681_v30  ;;  %v3737_v16 = vcombine.low %v3672_v40, %v3688_v29  ;;  %v3251_v40 = vld [vmem:[#allocation10 + $0x8] sm:$0xff] }
 0x745   :  { %v3689_v35 = vcombine.low %v3545_v28, %v3609_v34  ;;  %v3690_v36 = vcombine.high %v3545_v28, %v3609_v34  ;;  %v6327_v28 = vmov 0.0|0.0   ;;  %v6797_v29 = vpack.c.bf16 %v3251_v40, %v3250_v27 }
 0x746   :  { %v3729_v46 = vrot.slane %v3721_v38, %v6511_v25  ;;  %v3736_v51 = vrot.slane %v3722_v20, %v6511_v25  ;;  %v3745_v52 = vrot.slane %v3737_v16, %v6511_v25  ;;  %v6784_v53 = vrot.slane %v3738_v33, %v6511_v25  ;;  %6099 = vmatprep.subr.bf16.mxu0 %v6327_v28 }
 0x747   :  { %v3641_v37 = vpop.trf.xlu1  ;;  %v3697_v43 = vrot.slane %v3689_v35, %v6499_v18  ;;  %v3704_v44 = vrot.slane %v3690_v36, %v6499_v18  ;;  %6101 = vmatpush3.bf16.msra.mxu0 %v6797_v29 }
 0x748   :  { %v3705_v39 = vcombine.low %v3577_v32, %v3641_v37  ;;  %v3706_v42 = vcombine.high %v3577_v32, %v3641_v37  ;;  %6102 = vmatprep.subr.bf16.mxu0 %v6327_v28 }
 0x74a   :  { %v3713_v45 = vrot.slane %v3705_v39, %v6499_v18  ;;  %v3720_v21 = vrot.slane %v3706_v42, %v6499_v18 }
 0x74c   :  { %v3770_v7 = vcombine.high %v3704_v44, %v3720_v21  ;;  %v3753_v48 = vcombine.low %v3697_v43, %v3713_v45  ;;  %v3754_v49 = vcombine.high %v3697_v43, %v3713_v45  ;;  %v3769_v50 = vcombine.low %v3704_v44, %v3720_v21 }
 0x74e   :  { %v3761_v54 = vrot.slane %v3753_v48, %v6511_v25  ;;  %v3768_v41 = vrot.slane %v3754_v49, %v6511_v25  ;;  %v3777_v47 = vrot.slane %v3769_v50, %v6511_v25  ;;  %v6790_v55 = vrot.slane %v3770_v7, %v6511_v25 }
 0x750   :  { %v3786_v56 = vcombine.high %v3729_v46, %v3761_v54  ;;  %v3785_v57 = vcombine.low %v3729_v46, %v3761_v54  ;;  %v3791_v58 = vcombine.low %v6784_v53, %v6790_v55  ;;  %v3792_v59 = vcombine.high %v6784_v53, %v6790_v55 }
 0x751   :  { %v3787_v60 = vcombine.low %v3736_v51, %v3768_v41  ;;  %v3790_v61 = vcombine.high %v3745_v52, %v3777_v47  ;;  %v3788_v62 = vcombine.high %v3736_v51, %v3768_v41  ;;  %v3789_v63 = vcombine.low %v3745_v52, %v3777_v47 }
 0x752   :  { %3825 = vxpose.xlu0.b32.start.end [1/1] (short) (narrow) %v3786_v56, 8  ;;  %3793 = vxpose.xlu1.b32.start.end [1/1] (short) (narrow) %v3785_v57, 8  ;;  %v3252_v57 = vld [vmem:[#allocation10 + $0x10] sm:$0xff] }
 0x756   :  { %3857 = vxpose.xlu0.b32.start.end [1/1] (short) (narrow) %v3787_v60, 8  ;;  %3953 = vxpose.xlu1.b32.start.end [1/1] (short) (narrow) %v3790_v61, 8  ;;  %v3253_v60 = vld [vmem:[#allocation10 + $0x18] sm:$0xff] }
 0x75a   :  { %3889 = vxpose.xlu0.b32.start.end [1/1] (short) (narrow) %v3788_v62, 8 }
 0x75e   :  { %3921 = vxpose.xlu0.b32.start.end [1/1] (short) (narrow) %v3789_v63, 8 }
 0x772   :  { %v2737_v13 = vpop.f32.mrb[4].mxu0  ;;  %v2813_v14 = vpop.f32.mrb[8].mxu1 }
 0x773   :  { %v6005_v15 = vpop.f32.mrb[5].mxu0  ;;  %v6010_v19 = vpop.f32.mrb[9].mxu1  ;;  %3001 = vxpose.xlu0.b32.start.end [1/1] (short) (narrow) %v2813_v14, 8  ;;  %2969 = vxpose.xlu1.b32.start.end [1/1] (short) (narrow) %v2737_v13, 8  ;;  %v6823_v14 = vpack.c.bf16 %v3253_v60, %v3252_v57 }
 0x775   :  { %6104 = vmatpush3.bf16.msra.mxu0 %v6823_v14 }
 0x776   :  { %v2889_v22 = vpop.f32.mrb[6].mxu0  ;;  %v2965_v23 = vpop.f32.mrb[10].mxu1  ;;  %6042 = vmatprep.subr.mxu0 %v6319_v8 }
 0x777   :  { %v6015_v24 = vpop.f32.mrb[7].mxu0  ;;  %v6020_v26 = vpop.f32.mrb[11].mxu1  ;;  %3033 = vxpose.xlu0.b32.start.end [1/1] (short) (narrow) %v2889_v22, 8  ;;  %3065 = vxpose.xlu1.b32.start.end [1/1] (short) (narrow) %v2965_v23, 8 }
 0x7d2   :  { %v3841_v30 = vpop.trf.xlu0  ;;  %v3809_v31 = vpop.trf.xlu1 }
 0x7d6   :  { %v3873_v32 = vpop.trf.xlu0  ;;  %v6813_v43 = vpop.trf.xlu1 }
 0x7d7   :  { %v4049_v33 = vcombine.low %v3809_v31, %v3873_v32 }
 0x7d9   :  { %v6802_v36 = vrot.slane %v4049_v33, %v6499_v18 }
 0x7da   :  { %v3905_v34 = vpop.trf.xlu0 }
 0x7db   :  { %v4057_v35 = vcombine.low %v3841_v30, %v3905_v34 }
 0x7dd   :  { %v6805_v37 = vrot.slane %v4057_v35, %v6499_v18 }
 0x7de   :  { %v6811_v42 = vpop.trf.xlu0 }
 0x7df   :  { %v4081_v38 = vcombine.low %v6802_v36, %v6805_v37  ;;  %v4082_v39 = vcombine.high %v6802_v36, %v6805_v37  ;;  %v6170_v37 = vld [vmem:[#allocation2] sm:$0xff] }
 0x7e1   :  { %v4089_v57 = vrot.slane %v4081_v38, %v6511_v25  ;;  %v4096_v60 = vrot.slane %v4082_v39, %v6511_v25 }
 0x7f3   :  { %v3017_v44 = vpop.trf.xlu0  ;;  %v2985_v20 = vpop.trf.xlu1 }
 0x7f7   :  { %v3049_v16 = vpop.trf.xlu0  ;;  %v3081_v45 = vpop.trf.xlu1 }
 0x7f8   :  { %v3097_v21 = vcombine.low %v2985_v20, %v3049_v16  ;;  %v3098_v46 = vcombine.high %v2985_v20, %v3049_v16  ;;  %v3113_v7 = vcombine.low %v3017_v44, %v3081_v45  ;;  %v3114_v48 = vcombine.high %v3017_v44, %v3081_v45 }
 0x7fa   :  { %v3105_v49 = vrot.slane %v3097_v21, %v6499_v18  ;;  %v3112_v50 = vrot.slane %v3098_v46, %v6499_v18  ;;  %v3121_v51 = vrot.slane %v3113_v7, %v6499_v18  ;;  %v3128_v52 = vrot.slane %v3114_v48, %v6499_v18 }
 0x7fc   :  { %v3129_v54 = vcombine.low %v3105_v49, %v3121_v51  ;;  %v3130_v41 = vcombine.high %v3105_v49, %v3121_v51  ;;  %v3145_v47 = vcombine.low %v3112_v50, %v3128_v52  ;;  %v3146_v56 = vcombine.high %v3112_v50, %v3128_v52 }
 0x7fe   :  { %v3137_v61 = vrot.slane %v3129_v54, %v6511_v25  ;;  %v3144_v62 = vrot.slane %v3130_v41, %v6511_v25  ;;  %v3153_v63 = vrot.slane %v3145_v47, %v6511_v25  ;;  %v3160_v13 = vrot.slane %v3146_v56, %v6511_v25 }
 0x800   :  { %v3165_v15 = vcombine.low %v3137_v61, %v3144_v62  ;;  %v5884_v19 = vcombine.high %v3137_v61, %v3144_v62  ;;  %v3181_v22 = vcombine.low %v3153_v63, %v3160_v13  ;;  %v5885_v23 = vcombine.high %v3153_v63, %v3160_v13 }
 0x802   :  { %v3172_v24 = vrot.slane %v3165_v15, %v6499_v18  ;;  %v3180_v26 = vrot.slane %v5884_v19, %v6499_v18  ;;  %v3188_v27 = vrot.slane %v3181_v22, %v6499_v18  ;;  %v3196_v40 = vrot.slane %v5885_v23, %v6499_v18 }
 0x804   :  { %v3198_v30 = vcombine.high %v3172_v24, %v3180_v26  ;;  %v3214_v31 = vcombine.high %v3188_v27, %v3196_v40  ;;  %v3197_v32 = vcombine.low %v3172_v24, %v3180_v26  ;;  %v3213_v33 = vcombine.low %v3188_v27, %v3196_v40 }
 0x806   :  { %v3212_v34 = vrot.slane %v3198_v30, %v6511_v25  ;;  %v3228_v35 = vrot.slane %v3214_v31, %v6511_v25  ;;  %v3205_v44 = vrot.slane %v3197_v32, %v6511_v25  ;;  %v3221_v20 = vrot.slane %v3213_v33, %v6511_v25 }
 0x808   :  { %v3232_v16 = vcombine.high %v3212_v34, %v3228_v35  ;;  %v3230_v45 = vcombine.high %v3205_v44, %v3221_v20  ;;  %v3229_v21 = vcombine.low %v3205_v44, %v3221_v20  ;;  %v3231_v46 = vcombine.low %v3212_v34, %v3228_v35 }
 0x80a   :  { %3242 = vrot.lane.b32.xlu0 %v3232_v16, %s6328_s26  ;;  %3234 = vrot.lane.b32.xlu1 %v3230_v45, %s6315_s18 }
 0x80e   :  { %3238 = vrot.lane.b32.xlu1 %v3231_v46, %s6329_s27 }
 0x828   :  { %3985 = vxpose.xlu0.b32.start.end [1/1] (short) (narrow) %v3791_v58, 8 }
 0x837   :  { %4017 = vxpose.xlu1.b32.start.end [1/1] (short) (narrow) %v3792_v59, 8 }
 0x87c   :  { %v3235_v7 = vpop.permute.xlu1 %3234  ;;  %v3243_v50 = vpop.permute.xlu0 %3242 }
 0x87d   :  { %v3245_v48 = vsel %vm1604_vm2, %v3229_v21, %v3235_v7 }
 0x880   :  { %v3239_v49 = vpop.permute.xlu1 %3238 }
 0x881   :  { %v3247_v51 = vsel %vm3246_vm3, %v3245_v48, %v3239_v49 }
 0x882   :  { %v3249_v52 = vsel %vm3248_vm4, %v3247_v51, %v3243_v50 }
 0x883   :  { %6030 = vmatmul.mubr.msk.f32.vlgmr.msra.gmra.mrb[8].mxu0 %vm104_vm0, %v3249_v52 }
 0x884   :  { %6044 = vmatprep.mubr.msk.f32.mxu0 %vm6325_vm1, %v6319_v8 }
 0x8a8   :  { %v4001_v58 = vpop.trf.xlu0 }
 0x8a9   :  { %v4065_v53 = vcombine.low %v6811_v42, %v4001_v58 }
 0x8ab   :  { %v4072_v54 = vrot.slane %v4065_v53, %v6499_v18 }
 0x8b7   :  { %v4033_v55 = vpop.trf.xlu1 }
 0x8b8   :  { %v4073_v59 = vcombine.low %v6813_v43, %v4033_v55 }
 0x8ba   :  { %v4080_v41 = vrot.slane %v4073_v59, %v6499_v18 }
 0x8bc   :  { %v4097_v47 = vcombine.low %v4072_v54, %v4080_v41  ;;  %v4098_v56 = vcombine.high %v4072_v54, %v4080_v41 }
 0x8be   :  { %v4105_v42 = vrot.slane %v4097_v47, %v6511_v25  ;;  %v4112_v43 = vrot.slane %v4098_v56, %v6511_v25 }
 0x8c0   :  { %v4113_v61 = vcombine.low %v4089_v57, %v4105_v42  ;;  %v4115_v62 = vcombine.low %v4096_v60, %v4112_v43  ;;  %v4114_v63 = vcombine.high %v4089_v57, %v4105_v42  ;;  %v4116_v36 = vcombine.high %v4096_v60, %v4112_v43 }
 0x8c2   :  { %6033 = vmatpush3.msra.mxu1 %v4113_v61  ;;  %6043 = vmatpush3.msra.mxu0 %v4115_v62 }
 0x8c3   :  { %6035 = vmatmul.mubr.msk.f32.vlgmr.msra.gmra.mrb[12].mxu1 %vm1604_vm2, %v3397_v4  ;;  %6037 = vmatprep.subr.mxu1 %v6319_v8 }
 0x8c4   :  { %6045 = vmatmul.mubr.msk.f32.vlgmr.msra.gmra.mrb[10].mxu0 %vm1604_vm2, %v3399_v5  ;;  %6038 = vmatpush3.msra.mxu1 %v4114_v63 }
 0x8c5   :  { %6039 = vmatprep.mubr.msk.f32.mxu1 %vm6325_vm1, %v6319_v8  ;;  %6047 = vmatprep.subr.mxu1 %v6319_v8 }
 0x8c6   :  { %6052 = vmatprep.subr.mxu0 %v6319_v8  ;;  %6054 = vmatprep.mubr.msk.f32.mxu0 %vm6325_vm1, %v6319_v8 }
 0x8c7   :  { %6040 = vmatmul.mubr.msk.f32.vlgmr.msra.gmra.mrb[14].mxu1 %vm1604_vm2, %v3398_v9 }
 0x8c8   :  { %6048 = vmatpush3.msra.mxu1 %v4116_v36  ;;  %6049 = vmatprep.mubr.msk.f32.mxu1 %vm6325_vm1, %v6319_v8 }
 0x8c9   :  { %6057 = vmatprep.subr.mxu1 %v6319_v8 }
 0x8cb   :  { %6050 = vmatmul.mubr.msk.f32.vlgmr.msra.gmra.mrb[16].mxu1 %vm1604_vm2, %v3400_v12 }
 0x8cc   :  { %6059 = vmatprep.mubr.msk.f32.mxu1 %vm6325_vm1, %v6319_v8 }
 0x956   :  { %v3323_v1 = vpop.f32.mrb[8].mxu0 }
 0x957   :  { %v3329_v4 = vmul.f32 1.1111112, %v3323_v1  ;;  %v6031_v5 = vpop.f32.mrb[9].mxu0 }
 0x959   :  { %v3330_v9 = vsel %vm3328_vm5, %v3329_v4, 0.0 }
 0x95a   :  { %v3331_v38 = vadd.f32 %v6170_v37, %v3330_v9 }
 0x95c   :  { %3332 = vst.msk [vmem:[#allocation11] sm:$0xff] %vm104_vm0, %v3331_v38 }
 0x996   :  { %v4186_v39 = vpop.f32.mrb[12].mxu1 }
 0x997   :  { %v6896_v2 = vmul.f32 0.35355338, %v4186_v39  ;;  %v6898_v3 = vpop.f32.mrb[10].mxu0  ;;  %v6036_v12 = vpop.f32.mrb[13].mxu1 }
 0x998   :  { %v6046_v13 = vpop.f32.mrb[11].mxu0 }
 0x999   :  { %v4413_v15 = vsel %vm1604_vm2, %v6896_v2, -inf }
 0x99a   :  { %4414 = vmax.xlane.f32.xlu0 %v4413_v15  ;;  %v4259_v19 = vpop.f32.mrb[14].mxu1 }
 0x99b   :  { %v6902_v22 = vmul.f32 0.35355338, %v4259_v19  ;;  %v6041_v23 = vpop.f32.mrb[15].mxu1 }
 0x99d   :  { %v4416_v24 = vsel %vm1604_vm2, %v6902_v22, -inf }
 0x99e   :  { %4417 = vmax.xlane.f32.xlu1 %v4416_v24  ;;  %v4405_v26 = vpop.f32.mrb[16].mxu1 }
 0x99f   :  { %v6906_v27 = vmul.f32 0.35355338, %v4405_v26  ;;  %v6051_v40 = vpop.f32.mrb[17].mxu1 }
 0x9a1   :  { %v4422_v30 = vsel %vm1604_vm2, %v6906_v27, -inf }
 0x9a2   :  { %4423 = vmax.xlane.f32.xlu0 %v4422_v30 }
 0x9af   :  { %662 = vrot.lane.b32.xlu1 %v6483_v6, %s6326_s25 }
 0x9b3   :  { %670 = vrot.lane.b32.xlu1 %v6720_v17, %s6326_s25 }
 0x9b7   :  { %674 = vrot.lane.b32.xlu1 %v6714_v11, %s6326_s25 }
 0x9b8   :  { %666 = vrot.lane.b32.xlu0 %v6708_v10, %s6326_s25 }
 0xa27   :  { %v6920_v32 = vpop.xlane.xlu0 %4414 }
 0xa2b   :  { %v6918_v31 = vpop.xlane.xlu1 %4417 }
 0xa2f   :  { %v663_v33 = vpop.permute.xlu1 %662  ;;  %v6922_v34 = vpop.xlane.xlu0 %4423 }
 0xa33   :  { %v671_v35 = vpop.permute.xlu1 %670  ;;  %v667_v6 = vpop.permute.xlu0 %666 }
 0xa34   :  { %v752_v44 = vcombine.low %v663_v33, %v671_v35  ;;  %v753_v20 = vcombine.high %v663_v33, %v671_v35 }
 0xa36   :  { %v760_v21 = vrot.slane %v752_v44, %v6499_v18  ;;  %v767_v11 = vrot.slane %v753_v20, %v6499_v18 }
 0xa37   :  { %v675_v16 = vpop.permute.xlu1 %674 }
 0xa38   :  { %v768_v45 = vcombine.low %v667_v6, %v675_v16  ;;  %v769_v17 = vcombine.high %v667_v6, %v675_v16 }
 0xa3a   :  { %v776_v10 = vrot.slane %v768_v45, %v6499_v18  ;;  %v783_v46 = vrot.slane %v769_v17, %v6499_v18 }
 0xa3c   :  { %v784_v7 = vcombine.low %v760_v21, %v776_v10  ;;  %v800_v48 = vcombine.low %v767_v11, %v783_v46  ;;  %v801_v49 = vcombine.high %v767_v11, %v783_v46  ;;  %v785_v58 = vcombine.high %v760_v21, %v776_v10 }
 0xa3e   :  { %v792_v50 = vrot.slane %v784_v7, %v6511_v25  ;;  %v808_v51 = vrot.slane %v800_v48, %v6511_v25  ;;  %v815_v55 = vrot.slane %v801_v49, %v6511_v25  ;;  %v799_v59 = vrot.slane %v785_v58, %v6511_v25 }
 0xa40   :  { %4461 = vxpose.xlu1.b32.start.end [1/1] (short) (narrow) %v792_v50, 8  ;;  %v816_v52 = vcombine.high %v792_v50, %v6319_v8  ;;  %v818_v53 = vcombine.high %v808_v51, %v6319_v8  ;;  %v819_v54 = vcombine.high %v815_v55, %v6319_v8  ;;  %v817_v41 = vcombine.high %v799_v59, %v6319_v8 }
 0xa42   :  { %4493 = vxpose.xlu0.b32.start.end [1/1] (short) (narrow) %v816_v52, 8 }
 0xa44   :  { %4621 = vxpose.xlu1.b32.start.end [1/1] (short) (narrow) %v818_v53, 8 }
 0xa46   :  { %4525 = vxpose.xlu0.b32.start.end [1/1] (short) (narrow) %v799_v59, 8  ;;  %v4425_v59 = vsub.f32 %v6896_v2, %v6920_v32 }
 0xa48   :  { %4685 = vxpose.xlu1.b32.start.end [1/1] (short) (narrow) %v819_v54, 8  ;;  %v4429_v54 = vmul.f32 1.442695, %v4425_v59 }
 0xa4a   :  { %4557 = vxpose.xlu0.b32.start.end [1/1] (short) (narrow) %v817_v41, 8  ;;  %v4428_v41 = vsub.f32 %v6906_v27, %v6922_v34  ;;  %6154 = vpow2.f32 %v4429_v54 }
 0xa4e   :  { %4589 = vxpose.xlu0.b32.start.end [1/1] (short) (narrow) %v808_v51, 8 }
 0xa52   :  { %4653 = vxpose.xlu0.b32.start.end [1/1] (short) (narrow) %v815_v55, 8 }
 0xac0   :  { %v4477_v47 = vpop.trf.xlu1 }
 0xac2   :  { %v4509_v56 = vpop.trf.xlu0 }
 0xac4   :  { %v4637_v60 = vpop.trf.xlu1 }
 0xac6   :  { %v4541_v57 = vpop.trf.xlu0 }
 0xac7   :  { %v4718_v42 = vcombine.high %v4477_v47, %v4541_v57  ;;  %v4717_v4 = vcombine.low %v4477_v47, %v4541_v57  ;;  %v4411_v47 = vmul.f32 0.35355338, %v6898_v3  ;;  %v4426_v3 = vsub.f32 %v6902_v22, %v6918_v31 }
 0xac8   :  { %v4701_v0 = vpop.trf.xlu1 }
 0xac9   :  { %v4732_v62 = vrot.slane %v4718_v42, %v6499_v18  ;;  %v4765_v9 = vcombine.low %v4637_v60, %v4701_v0  ;;  %v4766_v38 = vcombine.high %v4637_v60, %v4701_v0  ;;  %v4725_v12 = vrot.slane %v4717_v4, %v6499_v18  ;;  %v6155_v60 = vpop.eup %6154 }
 0xaca   :  { %v4573_v43 = vpop.trf.xlu0  ;;  %v4419_v57 = vsel %vm1604_vm2, %v4411_v47, -inf  ;;  %v4437_v42 = vsel %vm1604_vm2, %v6155_v60, 0.0  ;;  %v4431_v27 = vmul.f32 1.442695, %v4426_v3 }
 0xacb   :  { %v4734_v61 = vcombine.high %v4509_v56, %v4573_v43  ;;  %v4733_v63 = vcombine.low %v4509_v56, %v4573_v43  ;;  %v4773_v19 = vrot.slane %v4765_v9, %v6499_v18  ;;  %v4780_v24 = vrot.slane %v4766_v38, %v6499_v18 }
 0xacc   :  { %v4435_v56 = vmul.f32 1.442695, %v4428_v41 }
 0xacd   :  { %v4748_v36 = vrot.slane %v4734_v61, %v6499_v18  ;;  %v4741_v37 = vrot.slane %v4733_v63, %v6499_v18 }
 0xace   :  { %v4605_v1 = vpop.trf.xlu0  ;;  %6156 = vpow2.f32 %v4435_v56 }
 0xacf   :  { %v4798_v5 = vcombine.high %v4732_v62, %v4748_v36  ;;  %v4781_v23 = vcombine.low %v4725_v12, %v4741_v37  ;;  %v4797_v30 = vcombine.low %v4732_v62, %v4748_v36  ;;  %v4782_v6 = vcombine.high %v4725_v12, %v4741_v37 }
 0xad0   :  { %6158 = vpow2.f32 %v4431_v27 }
 0xad1   :  { %v4789_v45 = vrot.slane %v4781_v23, %v6511_v25  ;;  %v6951_v11 = vrot.slane %v4798_v5, %v6511_v25  ;;  %v4805_v10 = vrot.slane %v4797_v30, %v6511_v25  ;;  %v4796_v52 = vrot.slane %v4782_v6, %v6511_v25 }
 0xad2   :  { %v4669_v39 = vpop.trf.xlu0 }
 0xad3   :  { %v4749_v13 = vcombine.low %v4605_v1, %v4669_v39  ;;  %v4750_v15 = vcombine.high %v4605_v1, %v4669_v39 }
 0xad5   :  { %v4757_v26 = vrot.slane %v4749_v13, %v6499_v18  ;;  %v4764_v40 = vrot.slane %v4750_v15, %v6499_v18 }
 0xad7   :  { %v4813_v33 = vcombine.low %v4757_v26, %v4773_v19  ;;  %v4814_v35 = vcombine.high %v4757_v26, %v4773_v19  ;;  %v4829_v44 = vcombine.low %v4764_v40, %v4780_v24  ;;  %v4830_v20 = vcombine.high %v4764_v40, %v4780_v24 }
 0xad8   :  { %v6967_v43 = vpop.eup %6156 }
 0xad9   :  { %v6945_v16 = vrot.slane %v4830_v20, %v6511_v25  ;;  %v4821_v17 = vrot.slane %v4813_v33, %v6511_v25  ;;  %v4837_v21 = vrot.slane %v4829_v44, %v6511_v25  ;;  %v4828_v48 = vrot.slane %v4814_v35, %v6511_v25 }
 0xada   :  { %v4446_v2 = vsel %vm1604_vm2, %v6967_v43, 0.0  ;;  %v6159_v61 = vpop.eup %6158 }
 0xadb   :  { %v4846_v46 = vcombine.high %v4789_v45, %v4821_v17  ;;  %v4845_v7 = vcombine.low %v4789_v45, %v4821_v17  ;;  %v4850_v49 = vcombine.high %v4805_v10, %v4837_v21  ;;  %v4851_v50 = vcombine.low %v6951_v11, %v6945_v16 }
 0xadc   :  { %v4852_v51 = vcombine.high %v6951_v11, %v6945_v16  ;;  %v4847_v58 = vcombine.low %v4796_v52, %v4828_v48  ;;  %v4848_v53 = vcombine.high %v4796_v52, %v4828_v48  ;;  %v4849_v55 = vcombine.low %v4805_v10, %v4837_v21 }
 0xadd   :  { %4885 = vxpose.xlu0.b32.start.end [1/1] (short) (narrow) %v4846_v46, 8  ;;  %4853 = vxpose.xlu1.b32.start.end [1/1] (short) (narrow) %v4845_v7, 8  ;;  %v4440_v62 = vsel %vm1604_vm2, %v6159_v61, 0.0 }
 0xae1   :  { %4917 = vxpose.xlu0.b32.start.end [1/1] (short) (narrow) %v4847_v58, 8  ;;  %4949 = vxpose.xlu1.b32.start.end [1/1] (short) (narrow) %v4848_v53, 8 }
 0xae5   :  { %4981 = vxpose.xlu0.b32.start.end [1/1] (short) (narrow) %v4849_v55, 8 }
 0xb08   :  { %4420 = vmax.xlane.f32.xlu1 %v4419_v57 }
 0xb12   :  { %4438 = vadd.xlane.f32.xlu0 %v4437_v42 }
 0xb16   :  { %4447 = vadd.xlane.f32.xlu0 %v4446_v2 }
 0xb3b   :  { %5013 = vxpose.xlu1.b32.start.end [1/1] (short) (narrow) %v4850_v49, 8 }
 0xb43   :  { %5045 = vxpose.xlu0.b32.start.end [1/1] (short) (narrow) %v4851_v50, 8 }
 0xb5d   :  { %v4901_v32 = vpop.trf.xlu0  ;;  %v4869_v34 = vpop.trf.xlu1 }
 0xb61   :  { %v4933_v63 = vpop.trf.xlu0  ;;  %v4965_v36 = vpop.trf.xlu1 }
 0xb62   :  { %4441 = vadd.xlane.f32.xlu1 %v4440_v62  ;;  %v5109_v0 = vcombine.low %v4869_v34, %v4933_v63  ;;  %v5117_v1 = vcombine.low %v4901_v32, %v4965_v36 }
 0xb64   :  { %v5116_v4 = vrot.slane %v5109_v0, %v6499_v18  ;;  %v5124_v5 = vrot.slane %v5117_v1, %v6499_v18 }
 0xb65   :  { %v4997_v39 = vpop.trf.xlu0 }
 0xb66   :  { %v5141_v9 = vcombine.low %v5116_v4, %v5124_v5  ;;  %v5142_v37 = vcombine.high %v5116_v4, %v5124_v5 }
 0xb68   :  { %v5149_v7 = vrot.slane %v5141_v9, %v6511_v25  ;;  %v5156_v48 = vrot.slane %v5142_v37, %v6511_v25 }
 0xb95   :  { %v4421_v38 = vpop.xlane.xlu1 %4420 }
 0xb96   :  { %v4427_v22 = vsub.f32 %v4411_v47, %v4421_v38 }
 0xb98   :  { %v4433_v31 = vmul.f32 1.442695, %v4427_v22 }
 0xb9a   :  { %6160 = vpow2.f32 %v4433_v31 }
 0xb9f   :  { %v4439_v12 = vpop.xlane.xlu0 %4438 }
 0xba0   :  { %6162 = vrcp.f32 %v4439_v12 }
 0xba3   :  { %v4448_v33 = vpop.xlane.xlu0 %4447 }
 0xba4   :  { %v6161_v13 = vpop.eup %6160 }
 0xba5   :  { %v4443_v15 = vsel %vm1604_vm2, %v6161_v13, 0.0 }
 0xba6   :  { %4444 = vadd.xlane.f32.xlu1 %v4443_v15 }
 0xbaa   :  { %v6163_v19 = vpop.eup %6162 }
 0xbab   :  { %v4457_v23 = vmul.f32 %v6163_v19, %v6155_v60 }
 0xbad   :  { %6053 = vmatpush3.xpose.msk.msra.mxu0 %vm1604_vm2, %v4457_v23 }
 0xbae   :  { %6062 = vmatprep.subr.mxu0 %v6319_v8 }
 0xbbb   :  { %v5029_v24 = vpop.trf.xlu1 }
 0xbc3   :  { %v5061_v44 = vpop.trf.xlu0 }
 0xbc4   :  { %v5125_v20 = vcombine.low %v4997_v39, %v5061_v44 }
 0xbc6   :  { %v5132_v45 = vrot.slane %v5125_v20, %v6499_v18 }
 0xbd9   :  { %5077 = vxpose.xlu1.b32.start.end [1/1] (short) (narrow) %v4852_v51, 8 }
 0xbef   :  { %v4442_v26 = vpop.xlane.xlu1 %4441 }
 0xbf0   :  { %6164 = vrcp.f32 %v4442_v26 }
 0xbf1   :  { %6166 = vrcp.f32 %v4448_v33 }
 0xbfa   :  { %v6165_v40 = vpop.eup %6164 }
 0xbfb   :  { %v4458_v30 = vmul.f32 %v6165_v40, %v6159_v61  ;;  %v6167_v10 = vpop.eup %6166 }
 0xbfc   :  { %v4460_v55 = vmul.f32 %v6167_v10, %v6967_v43 }
 0xbfd   :  { %6058 = vmatpush3.xpose.msk.msra.mxu1 %vm1604_vm2, %v4458_v30 }
 0xbfe   :  { %6067 = vmatprep.subr.mxu1 %v6319_v8 }
 0xc33   :  { %v4445_v35 = vpop.xlane.xlu1 %4444 }
 0xc34   :  { %6168 = vrcp.f32 %v4445_v35 }
 0xc3e   :  { %v6169_v46 = vpop.eup %6168 }
 0xc3f   :  { %v4459_v59 = vmul.f32 %v6169_v46, %v6161_v13 }
 0xc59   :  { %v5093_v6 = vpop.trf.xlu1 }
 0xc5a   :  { %v5133_v16 = vcombine.low %v5029_v24, %v5093_v6 }
 0xc5c   :  { %v5140_v17 = vrot.slane %v5133_v16, %v6499_v18 }
 0xc5e   :  { %v5157_v21 = vcombine.low %v5132_v45, %v5140_v17  ;;  %v5158_v11 = vcombine.high %v5132_v45, %v5140_v17 }
 0xc60   :  { %v5165_v49 = vrot.slane %v5157_v21, %v6511_v25  ;;  %v5172_v50 = vrot.slane %v5158_v11, %v6511_v25 }
 0xc62   :  { %v5173_v51 = vcombine.low %v5149_v7, %v5165_v49  ;;  %v5174_v52 = vcombine.high %v5149_v7, %v5165_v49  ;;  %v5175_v58 = vcombine.low %v5156_v48, %v5172_v50  ;;  %v5176_v53 = vcombine.high %v5156_v48, %v5172_v50 }
 0xc64   :  { %6055 = vmatmul.mubr.msk.f32.vlgmr.msra.gmra.mrb[12].mxu0 %vm1604_vm2, %v5173_v51  ;;  %6060 = vmatmul.mubr.msk.f32.vlgmr.msra.gmra.mrb[18].mxu1 %vm1604_vm2, %v5174_v52  ;;  %v6171_v52 = vld [vmem:[#allocation2 + $0x8] sm:$0xff] }
 0xc65   :  { %6063 = vmatpush3.xpose.msk.msra.mxu0 %vm1604_vm2, %v4459_v59  ;;  %6068 = vmatpush3.xpose.msk.msra.mxu1 %vm1604_vm2, %v4460_v55 }
 0xc66   :  { %6064 = vmatprep.mubr.msk.f32.mxu0 %vm6325_vm1, %v6319_v8  ;;  %6069 = vmatprep.mubr.msk.f32.mxu1 %vm6325_vm1, %v6319_v8 }
 0xc67   :  { %6105 = vmatprep.subr.bf16.mxu0 %v6327_v28 }
 0xc68   :  { %6065 = vmatmul.mubr.msk.f32.vlgmr.msra.gmra.mrb[14].mxu0 %vm1604_vm2, %v5175_v58  ;;  %6070 = vmatmul.mubr.msk.f32.vlgmr.msra.gmra.mrb[20].mxu1 %vm1604_vm2, %v5176_v53 }
 0xc69   :  { %6107 = vmatpush3.bf16.msra.mxu0 %v6797_v29  ;;  %6080 = vmatprep.mubr.msk.f32.mxu0 %vm6325_vm1, %v6319_v8 }
 0xc6a   :  { %6108 = vmatprep.subr.bf16.mxu0 %v6327_v28 }
 0xc6d   :  { %6110 = vmatpush3.bf16.msra.mxu0 %v6823_v14 }
 0xd37   :  { %v5249_v54 = vpop.f32.mrb[12].mxu0  ;;  %v5325_v41 = vpop.f32.mrb[18].mxu1 }
 0xd38   :  { %5513 = vxpose.xlu1.b32.start.end [1/1] (short) (narrow) %v5325_v41, 8  ;;  %v6061_v47 = vpop.f32.mrb[19].mxu1  ;;  %5481 = vxpose.xlu0.b32.start.end [1/1] (short) (narrow) %v5249_v54, 8  ;;  %v6056_v56 = vpop.f32.mrb[13].mxu0 }
 0xd3b   :  { %v5401_v57 = vpop.f32.mrb[14].mxu0  ;;  %v5477_v60 = vpop.f32.mrb[20].mxu1 }
 0xd3c   :  { %5577 = vxpose.xlu1.b32.start.end [1/1] (short) (narrow) %v5477_v60, 8  ;;  %v6071_v42 = vpop.f32.mrb[21].mxu1  ;;  %5545 = vxpose.xlu0.b32.start.end [1/1] (short) (narrow) %v5401_v57, 8  ;;  %v6066_v43 = vpop.f32.mrb[15].mxu0 }
 0xdb8   :  { %v5529_v29 = vpop.trf.xlu1  ;;  %v5497_v2 = vpop.trf.xlu0 }
 0xdbc   :  { %v5593_v3 = vpop.trf.xlu1  ;;  %v5561_v8 = vpop.trf.xlu0 }
 0xdbd   :  { %v5625_v27 = vcombine.low %v5529_v29, %v5593_v3  ;;  %v5626_v28 = vcombine.high %v5529_v29, %v5593_v3  ;;  %v5609_v32 = vcombine.low %v5497_v2, %v5561_v8  ;;  %v5610_v14 = vcombine.high %v5497_v2, %v5561_v8 }
 0xdbf   :  { %v5633_v34 = vrot.slane %v5625_v27, %v6499_v18  ;;  %v5640_v61 = vrot.slane %v5626_v28, %v6499_v18  ;;  %v5617_v62 = vrot.slane %v5609_v32, %v6499_v18  ;;  %v5624_v63 = vrot.slane %v5610_v14, %v6499_v18 }
 0xdc1   :  { %v5641_v36 = vcombine.low %v5617_v62, %v5633_v34  ;;  %v5642_v0 = vcombine.high %v5617_v62, %v5633_v34  ;;  %v5657_v1 = vcombine.low %v5624_v63, %v5640_v61  ;;  %v5658_v4 = vcombine.high %v5624_v63, %v5640_v61 }
 0xdc3   :  { %v5649_v5 = vrot.slane %v5641_v36, %v6511_v25  ;;  %v5656_v9 = vrot.slane %v5642_v0, %v6511_v25  ;;  %v5665_v37 = vrot.slane %v5657_v1, %v6511_v25  ;;  %v5672_v38 = vrot.slane %v5658_v4, %v6511_v25 }
 0xdc5   :  { %v5677_v22 = vcombine.low %v5649_v5, %v5656_v9  ;;  %v5901_v31 = vcombine.high %v5649_v5, %v5656_v9  ;;  %v5693_v39 = vcombine.low %v5665_v37, %v5672_v38  ;;  %v5902_v12 = vcombine.high %v5665_v37, %v5672_v38 }
 0xdc7   :  { %v5684_v13 = vrot.slane %v5677_v22, %v6499_v18  ;;  %v5692_v15 = vrot.slane %v5901_v31, %v6499_v18  ;;  %v5700_v19 = vrot.slane %v5693_v39, %v6499_v18  ;;  %v5708_v23 = vrot.slane %v5902_v12, %v6499_v18 }
 0xdc9   :  { %v5710_v24 = vcombine.high %v5684_v13, %v5692_v15  ;;  %v5726_v26 = vcombine.high %v5700_v19, %v5708_v23  ;;  %v5709_v40 = vcombine.low %v5684_v13, %v5692_v15  ;;  %v5725_v30 = vcombine.low %v5700_v19, %v5708_v23 }
 0xdcb   :  { %v5724_v33 = vrot.slane %v5710_v24, %v6511_v25  ;;  %v5740_v35 = vrot.slane %v5726_v26, %v6511_v25  ;;  %v5717_v44 = vrot.slane %v5709_v40, %v6511_v25  ;;  %v5733_v20 = vrot.slane %v5725_v30, %v6511_v25  ;;  %v5904_v25 = vld [vmem:[%s7053_s7 + $0x8] sm:$0xff] }
 0xdcc   :  { %vm5839_vm6 = vcmp.ge.f32.partialorder %v5904_v25, 0.1 }
 0xdcd   :  { %v5743_v6 = vcombine.low %v5724_v33, %v5740_v35  ;;  %v5742_v16 = vcombine.high %v5717_v44, %v5733_v20  ;;  %v5741_v45 = vcombine.low %v5717_v44, %v5733_v20  ;;  %v5744_v18 = vcombine.high %v5724_v33, %v5740_v35 }
 0xdcf   :  { %5750 = vrot.lane.b32.xlu1 %v5743_v6, %s6329_s27  ;;  %5746 = vrot.lane.b32.xlu0 %v5742_v16, %s6315_s18 }
 0xdd3   :  { %5754 = vrot.lane.b32.xlu1 %v5744_v18, %s6328_s26 }
 0xe41   :  { %v5751_v17 = vpop.permute.xlu1 %5750  ;;  %v5747_v21 = vpop.permute.xlu0 %5746 }
 0xe42   :  { %v5757_v11 = vsel %vm1604_vm2, %v5741_v45, %v5747_v21 }
 0xe43   :  { %v5758_v46 = vsel %vm3246_vm3, %v5757_v11, %v5751_v17 }
 0xe45   :  { %v5755_v10 = vpop.permute.xlu1 %5754 }
 0xe46   :  { %v5759_v7 = vsel %vm3248_vm4, %v5758_v46, %v5755_v10 }
 0xe47   :  { %6081 = vmatmul.mubr.msk.f32.vlgmr.msra.gmra.mrb[16].mxu0 %vm104_vm0, %v5759_v7 }
 0xf1a   :  { %v5833_v48 = vpop.f32.mrb[16].mxu0 }
 0xf1b   :  { %v5840_v49 = vmul.f32 1.1111112, %v5833_v48  ;;  %v6082_v50 = vpop.f32.mrb[17].mxu0 }
 0xf1d   :  { %v5841_v51 = vsel %vm5839_vm6, %v5840_v49, 0.0 }
 0xf1e   :  { %v5842_v58 = vadd.f32 %v6171_v52, %v5841_v51 }
 0xf20   :  { %5844 = vst.msk [vmem:[#allocation11 + $0x8] sm:$0xff] %vm104_vm0, %v5842_v58 }
 0xf21   :  { %6293 = shalt.err (!%p6290_p2)
}
 0xf22   :  { %s6294_s14 = scalar_lea.hbm %s7054_s8, 256 }
 0xf23   :  { %p6295_p3 = scmp.ne.s32.totalorder %s7054_s8, %s6294_s14  ;;  %p6298_p4 = scmp.lt.u32.totalorder %s6294_s14, %s7054_s8 }
 0xf25   :  { %p6300_p5 = pnand %p6298_p4, %p6295_p3 }
 0xf27   :  { %6303 = shalt.err (!%p6300_p5)
}
 0xf28   :  { %5856 = dma.vmem_to_hbm [thread:$0]  %s5851_s10, 256, %s7054_s8, [#allocation4], %s6314_s17, %s6314_s17, %s6315_s18  }
 0xf29   :  { %6310 = dma.done.wait [#allocation4], 256  }
 0xf2a   :  { %6311 = vsyncadd [#allocation4], 4294967040 }
 0xf2b   :  { %5860 = vsyncpa [#allocation3], 1 }
 0xf2c   :  { %5861 = vsyncpa [#allocation6], 1 }
 0xf2d   :  { %5862 = vsyncpa [#allocation9], 1 }
 0xf2e   :  { %5863 = vsyncpa [#allocation4], 1 }

</bundles_post_ra>
